<compile_context>
chip_gen: v5e
topology: v5e:2x2
jax: 0.10.0
libtpu: 0.0.40
codegen_flags: <defaults>
</compile_context>

<pallas_src>
import jax
import jax.numpy as jnp
from jax import lax
from jax.experimental import pallas as pl
from jax.experimental.pallas import tpu as pltpu

_LANE = 128
_FC_HIDDEN = 128   # padded lane width for the 100/50/25 FC hidden layers


# ---------------------------------------------------------------------------
# Shared in-kernel helpers.
# ---------------------------------------------------------------------------
def _shifted_stack(x, K):
    """(Cin, L) -> (K*Cin, L); row k*Cin + c holds x[c, l + k - pad] (zero pad)."""
    Cin, L = x.shape
    pad = (K - 1) // 2
    if L % _LANE == 0:
        # Lane-aligned: XLU roll + boundary mask keeps the VALU/vst slots free.
        lane = lax.broadcasted_iota(jnp.int32, (Cin, L), 1)
        parts = []
        for k in range(K):
            d = k - pad
            r = x if d == 0 else pltpu.roll(x, shift=(-d) % L, axis=1)
            parts.append(jnp.where((lane >= -d) & (lane < L - d), r,
                                   jnp.zeros_like(r)))
        return jnp.concatenate(parts, axis=0)
    # Small / unaligned L: zero-pad along lanes + K static slices.
    xp = jnp.concatenate(
        [jnp.zeros((Cin, pad), x.dtype), x,
         jnp.zeros((Cin, K - 1 - pad), x.dtype)], axis=1)
    return jnp.concatenate([xp[:, k:k + L] for k in range(K)], axis=0)


def _conv_relu(x_bf16, w_stk, b_col, K):
    """'same' Conv1d + ReLU as ONE MXU matmul: (Cout, K*Cin)@(K*Cin, L) + b."""
    rhs = _shifted_stack(x_bf16, K)                               # bf16
    y = jnp.dot(w_stk, rhs, preferred_element_type=jnp.float32) + b_col
    return jnp.maximum(y, 0.0).astype(jnp.bfloat16)


def _fc_tail(z1, f1b, f2w, f2b, f3w, f3b, f4w, f4b, n_fam):
    """relu(fc1) -> fc2/leaky -> fc3/relu -> fc4/relu -> masked softmax."""
    a = jnp.maximum(z1 + f1b, 0.0)                                # relu(fc1)
    z = jnp.dot(a, f2w, preferred_element_type=jnp.float32) + f2b
    a = jnp.where(z > 0, z, 0.01 * z)                             # leaky_relu
    z = jnp.dot(a, f3w, preferred_element_type=jnp.float32) + f3b
    a = jnp.maximum(z, 0.0)                                       # relu(fc3)
    z = jnp.dot(a, f4w, preferred_element_type=jnp.float32) + f4b
    a = jnp.maximum(z, 0.0)                                       # relu(fc4)
    col = lax.broadcasted_iota(jnp.int32, a.shape, 1)
    a = jnp.where(col < n_fam, a, -1e30)                          # mask padding
    a = a - jnp.max(a, axis=-1, keepdims=True)
    e = jnp.exp(a)
    return e * pl.reciprocal(jnp.sum(e, axis=-1, keepdims=True), approx=False)


# ---------------------------------------------------------------------------
# Wrapper-side helpers.
# ---------------------------------------------------------------------------
def _resident_spec(a):
    """Full-array block, constant index map -> stays VMEM-resident (no re-DMA)."""
    nd = a.ndim
    return pl.BlockSpec(a.shape, lambda *_: (0,) * nd)


def _nbytes(a):
    return int(a.size) * a.dtype.itemsize


def _vmem_capacity():
    try:
        return int(pltpu.get_tpu_info().vmem_capacity_bytes)
    except Exception:
        return 64 * 2 ** 20          # conservative (v7x per-TensorCore VMEM)


def _vmem_limit(estimate_bytes, capacity):
    hi = max(32 * 2 ** 20, capacity - 8 * 2 ** 20)   # never exceed physical VMEM
    return int(min(hi, max(32 * 2 ** 20, int(estimate_bytes) + (4 << 20))))


def _pick_k_tile(total, cap):
    """Return (tile, padded_total): tile is a 128-multiple (or == total)."""
    cap = max(_LANE, cap - cap % _LANE)
    if total <= cap:
        return total, total
    t = cap
    while t >= _LANE:
        if total % t == 0:
            return t, total
        t -= _LANE
    return cap, int(pl.cdiv(total, cap)) * cap        # pad contraction dim


def _pick_batch_tile(n_pad):
    for t in (256, 128, 64, 32, 16, 8):
        if n_pad % t == 0:
            return t
    return n_pad


# ---------------------------------------------------------------------------
# Forward pass.
# ---------------------------------------------------------------------------
def rna_mlp_classifier(x, params):
    n, cin, L = x.shape
    c3 = L // 4
    n_fam = params["fc4_w"].shape[0]
    H = _FC_HIDDEN
    Hout = max(_LANE, int(pl.cdiv(n_fam, _LANE)) * _LANE)
    capacity = _vmem_capacity()

    d1 = params["fc1_w"].shape[0]
    d2 = params["fc2_w"].shape[0]
    d3 = params["fc3_w"].shape[0]
    assert max(d1, d2, d3) <= H

    # ---- wrapper-side weight prep (free XLA ops) ----------------------------
    def stack_conv(w):                       # (Cout, Cin, K) -> (Cout, K*Cin)
        co, ci, kk = w.shape
        return jnp.transpose(w, (0, 2, 1)).reshape(co, kk * ci).astype(jnp.bfloat16)

    def pad2(a, rows, cols):
        return jnp.pad(a, ((0, rows - a.shape[0]), (0, cols - a.shape[1])))

    c1w, c1b = stack_conv(params["conv1_w"]), params["conv1_b"][:, None]
    c2w, c2b = stack_conv(params["conv2_w"]), params["conv2_b"][:, None]
    c3w, c3b = stack_conv(params["conv3_w"]), params["conv3_b"][:, None]
    # fc1 in torch-Flatten (channel-major, c*L + l) order, padded to 128 lanes.
    f1w_r = pad2(params["fc1_w"].T, c3 * L, H).reshape(c3, L, H).astype(jnp.bfloat16)
    f1b = jnp.pad(params["fc1_b"], (0, H - d1))[None, :]
    f2w = pad2(params["fc2_w"].T, H, H)                 # tiny -> keep f32
    f2b = jnp.pad(params["fc2_b"], (0, H - d2))[None, :]
    f3w = pad2(params["fc3_w"].T, H, H)
    f3b = jnp.pad(params["fc3_b"], (0, H - d3))[None, :]
    f4w = pad2(params["fc4_w"].T, H, Hout)
    f4b = jnp.pad(params["fc4_b"], (0, Hout - n_fam))[None, :]

    conv_weight_args = (c1w, c1b, c2w, c2b, c3w, c3b)
    tail_args = (f1b, f2w, f2b, f3w, f3b, f4w, f4b)

    # ---- batch tiling --------------------------------------------------------
    Bt = min(8, n)
    n_pad = int(pl.cdiv(n, Bt)) * Bt
    xb = x if n_pad == n else jnp.pad(x, ((0, n_pad - n), (0, 0), (0, 0)))

    conv_tmp_bytes = 24 * L * L + 4096       # per-sample stacks + f32 conv outs
    conv_flops = 2 * n_pad * (L * 12 * L + (L // 2) * (5 * L) * L
                              + c3 * (3 * (L // 2)) * L)

    # =================== fused path: conv + fc + softmax =====================
    fused_resident = (sum(_nbytes(a) for a in conv_weight_args)
                      + _nbytes(f1w_r) + sum(_nbytes(a) for a in tail_args))
    fused_est = (fused_resident
                 + 2 * (Bt * cin * L * x.dtype.itemsize + Bt * Hout * 4)
                 + c3 * Bt * L * 2 + Bt * H * 4 + conv_tmp_bytes)
    use_fused = fused_est <= (3 * capacity) // 4

    if use_fused:
        def fused_kernel(x_ref, c1w_ref, c1b_ref, c2w_ref, c2b_ref, c3w_ref,
                         c3b_ref, f1w_ref, f1b_ref, f2w_ref, f2b_ref, f3w_ref,
                         f3b_ref, f4w_ref, f4b_ref, out_ref, h_scr):
            # Conv stack, one sample at a time (static unroll over the tile).
            for i in range(Bt):
                xi = x_ref[i].astype(jnp.bfloat16)                  # (cin, L)
                h = _conv_relu(xi, c1w_ref[...], c1b_ref[...], 3)   # (L,   L)
                h = _conv_relu(h, c2w_ref[...], c2b_ref[...], 5)    # (L/2, L)
                h = _conv_relu(h, c3w_ref[...], c3b_ref[...], 3)    # (c3,  L)
                h_scr[:, i:i + 1, :] = h[:, None, :]                # channel-major

            # fc1: contract over L on the MXU and over c3 with a short loop; no
            # in-kernel flatten relayout (Flatten order is baked into f1w_r).
            def fc1_step(c, acc):
                return acc + jnp.dot(h_scr[c], f1w_ref[c],
                                     preferred_element_type=jnp.float32)

            z0 = jnp.zeros((Bt, H), jnp.float32)
            if c3 <= 8:
                z1 = lax.fori_loop(0, c3, fc1_step, z0, unroll=True)
            else:
                z1 = lax.fori_loop(0, c3, fc1_step, z0)

            out_ref[...] = _fc_tail(
                z1, f1b_ref[...], f2w_ref[...], f2b_ref[...], f3w_ref[...],
                f3b_ref[...], f4w_ref[...], f4b_ref[...], n_fam
            ).astype(out_ref.dtype)

        fused_args = (xb,) + conv_weight_args + (f1w_r,) + tail_args
        fc_flops = 2 * n_pad * (c3 * L * H + 3 * H * H)
        out_full = pl.pallas_call(
            fused_kernel,
            out_shape=jax.ShapeDtypeStruct((n_pad, Hout), jnp.float32),
            grid_spec=pltpu.PrefetchScalarGridSpec(
                num_scalar_prefetch=0,
                grid=(n_pad // Bt,),
                in_specs=[pl.BlockSpec((Bt, cin, L), lambda b: (b, 0, 0))]
                         + [_resident_spec(a) for a in fused_args[1:]],
                out_specs=pl.BlockSpec((Bt, Hout), lambda b: (b, 0)),
                scratch_shapes=[pltpu.VMEM((c3, Bt, L), jnp.bfloat16)]),
            compiler_params=pltpu.CompilerParams(
                dimension_semantics=("parallel",),
                vmem_limit_bytes=_vmem_limit(fused_est, capacity)),
            cost_estimate=pl.CostEstimate(
                flops=conv_flops + fc_flops, transcendentals=n_pad * Hout,
                bytes_accessed=_nbytes(xb) + fused_resident + n_pad * Hout * 4),
        )(*fused_args)
        return out_full[:n, :n_fam]

    # ============ fallback (large L / small VMEM): conv + K-tiled fc =========
    def conv_kernel(x_ref, c1w_ref, c1b_ref, c2w_ref, c2b_ref, c3w_ref, c3b_ref,
                    h_ref):
        for i in range(Bt):
            xi = x_ref[i].astype(jnp.bfloat16)
            h = _conv_relu(xi, c1w_ref[...], c1b_ref[...], 3)
            h = _conv_relu(h, c2w_ref[...], c2b_ref[...], 5)
            h = _conv_relu(h, c3w_ref[...], c3b_ref[...], 3)
            h_ref[i] = h

    conv_resident = sum(_nbytes(a) for a in conv_weight_args)
    conv_est = (conv_resident + conv_tmp_bytes
                + 2 * (Bt * cin * L * x.dtype.itemsize + Bt * c3 * L * 2))
    h3 = pl.pallas_call(
        conv_kernel,
        out_shape=jax.ShapeDtypeStruct((n_pad, c3, L), jnp.bfloat16),
        grid_spec=pltpu.PrefetchScalarGridSpec(
            num_scalar_prefetch=0,
            grid=(n_pad // Bt,),
            in_specs=[pl.BlockSpec((Bt, cin, L), lambda b: (b, 0, 0))]
                     + [_resident_spec(a) for a in conv_weight_args],
            out_specs=pl.BlockSpec((Bt, c3, L), lambda b: (b, 0, 0))),
        compiler_params=pltpu.CompilerParams(
            dimension_semantics=("parallel",),
            vmem_limit_bytes=_vmem_limit(conv_est, capacity)),
        cost_estimate=pl.CostEstimate(
            flops=conv_flops, transcendentals=0,
            bytes_accessed=_nbytes(xb) + conv_resident + n_pad * c3 * L * 2),
    )((xb,) + conv_weight_args)[0] if False else pl.pallas_call(
        conv_kernel,
        out_shape=jax.ShapeDtypeStruct((n_pad, c3, L), jnp.bfloat16),
        grid_spec=pltpu.PrefetchScalarGridSpec(
            num_scalar_prefetch=0,
            grid=(n_pad // Bt,),
            in_specs=[pl.BlockSpec((Bt, cin, L), lambda b: (b, 0, 0))]
                     + [_resident_spec(a) for a in conv_weight_args],
            out_specs=pl.BlockSpec((Bt, c3, L), lambda b: (b, 0, 0))),
        compiler_params=pltpu.CompilerParams(
            dimension_semantics=("parallel",),
            vmem_limit_bytes=_vmem_limit(conv_est, capacity)),
        cost_estimate=pl.CostEstimate(
            flops=conv_flops, transcendentals=0,
            bytes_accessed=_nbytes(xb) + conv_resident + n_pad * c3 * L * 2),
    )(xb, *conv_weight_args)

    # torch.nn.Flatten: free row-major reshape (channel-major order c*L + l).
    kdim = c3 * L
    hflat = h3.reshape(n_pad, kdim)
    f1w2d = f1w_r.reshape(kdim, H)

    tb = _pick_batch_tile(n_pad)
    tk_cap = 8192 if capacity <= 64 * 2 ** 20 else 16384   # bigger tiles off-v7x
    tk, kdim_pad = _pick_k_tile(kdim, tk_cap)
    if kdim_pad != kdim:
        hflat = jnp.pad(hflat, ((0, 0), (0, kdim_pad - kdim)))
        f1w2d = jnp.pad(f1w2d, ((0, kdim_pad - kdim), (0, 0)))

    def fc_kernel(hflat_ref, f1w_ref, f1b_ref, f2w_ref, f2b_ref, f3w_ref,
                  f3b_ref, f4w_ref, f4b_ref, out_ref, acc_ref):
        k = pl.program_id(1)

        @pl.when(k == 0)
        def _init():
            acc_ref[...] = jnp.zeros_like(acc_ref)

        acc_ref[...] += jnp.dot(hflat_ref[...], f1w_ref[...],
                                preferred_element_type=jnp.float32)

        @pl.when(k == pl.num_programs(1) - 1)
        def _tail():
            out_ref[...] = _fc_tail(
                acc_ref[...], f1b_ref[...], f2w_ref[...], f2b_ref[...],
                f3w_ref[...], f3b_ref[...], f4w_ref[...], f4b_ref[...], n_fam
            ).astype(out_ref.dtype)

    tail_bytes = sum(_nbytes(a) for a in tail_args)
    fc_est = (3 * 2 * tk * (tb + H) + tail_bytes + tb * H * 4 + 2 * tb * Hout * 4)
    fc_flops = 2 * n_pad * (kdim_pad * H + 3 * H * H)
    out_full = pl.pallas_call(
        fc_kernel,
        out_shape=jax.ShapeDtypeStruct((n_pad, Hout), jnp.float32),
        grid_spec=pltpu.PrefetchScalarGridSpec(
            num_scalar_prefetch=0,
            grid=(n_pad // tb, kdim_pad // tk),
            in_specs=[pl.BlockSpec((tb, tk), lambda b, k: (b, k),
                                   pipeline_mode=pl.Buffered(3)),
                      pl.BlockSpec((tk, H), lambda b, k: (k, 0),
                                   pipeline_mode=pl.Buffered(3))]
                     + [_resident_spec(a) for a in tail_args],
            out_specs=pl.BlockSpec((tb, Hout), lambda b, k: (b, 0)),
            scratch_shapes=[pltpu.VMEM((tb, H), jnp.float32)]),
        compiler_params=pltpu.CompilerParams(
            dimension_semantics=("parallel", "arbitrary"),
            vmem_limit_bytes=_vmem_limit(fc_est, capacity)),
        cost_estimate=pl.CostEstimate(
            flops=fc_flops, transcendentals=n_pad * Hout,
            bytes_accessed=_nbytes(hflat) + _nbytes(f1w2d) + tail_bytes
                           + n_pad * Hout * 4),
    )(hflat, f1w2d, *tail_args)
    return out_full[:n, :n_fam]


# ---------------------------------------------------------------------------
# Parameter init and pure-JAX reference (mirrors the PyTorch forward).
# ---------------------------------------------------------------------------
def init_params(key, rna_length, n_families):
    L = rna_length
    shapes = {
        "conv1_w": (L, 4, 3), "conv1_b": (L,),
        "conv2_w": (L // 2, L, 5), "conv2_b": (L // 2,),
        "conv3_w": (L // 4, L // 2, 3), "conv3_b": (L // 4,),
        "fc1_w": (100, L * (L // 4)), "fc1_b": (100,),
        "fc2_w": (50, 100), "fc2_b": (50,),
        "fc3_w": (25, 50), "fc3_b": (25,),
        "fc4_w": (n_families, 25), "fc4_b": (n_families,),
    }
    params = {}
    keys = jax.random.split(key, len(shapes))
    for k, (name, shape) in zip(keys, shapes.items()):
        params[name] = 0.1 * jax.random.normal(k, shape, jnp.float32)
    return params


def reference(x, p):
    def conv1d(h, w, b):
        y = lax.conv_general_dilated(h, w, window_strides=(1,), padding="SAME",
                                     dimension_numbers=("NCH", "OIH", "NCH"))
        return y + b[None, :, None]
    h = jax.nn.relu(conv1d(x, p["conv1_w"], p["conv1_b"]))
    h = jax.nn.relu(conv1d(h, p["conv2_w"], p["conv2_b"]))
    h = jax.nn.relu(conv1d(h, p["conv3_w"], p["conv3_b"]))
    h = h.reshape(h.shape[0], -1)
    h = jax.nn.relu(h @ p["fc1_w"].T + p["fc1_b"])
    h = jax.nn.leaky_relu(h @ p["fc2_w"].T + p["fc2_b"], 0.01)
    h = jax.nn.relu(h @ p["fc3_w"].T + p["fc3_b"])
    h = jax.nn.relu(h @ p["fc4_w"].T + p["fc4_b"])
    return jax.nn.softmax(h, axis=1)


if __name__ == "__main__":
    rna_length, n_families, batch = 16, 8, 2
    key = jax.random.PRNGKey(0)
    pkey, xkey = jax.random.split(key)
    params = init_params(pkey, rna_length, n_families)

    # One-hot RNA sequence, laid out NCL = (batch, 4, rna_length)
    idx = jax.random.randint(xkey, (batch, rna_length), 0, 4)
    x = jnp.transpose(jax.nn.one_hot(idx, 4, dtype=jnp.float32), (0, 2, 1))

    out = jax.block_until_ready(rna_mlp_classifier(x, params))
    ref = reference(x, params)
    assert out.shape == (batch, n_families)
    # bf16 conv/fc1 weights + activations inside the kernel -> relaxed tolerance.
    err = float(jnp.max(jnp.abs(out - ref)))
    assert err < 2e-2, f"max abs diff {err}"
    print("KERNEL_OK")
</pallas_src>

<mosaic_0001>
module attributes {stable_mosaic.version = 11 : i64} {
  func.func @fused_kernel(%arg0: i32, %arg1: memref<2x4x16xf32, #tpu.memory_space<vmem>>, %arg2: memref<16x12xbf16, #tpu.memory_space<vmem>>, %arg3: memref<16x1xf32, #tpu.memory_space<vmem>>, %arg4: memref<8x80xbf16, #tpu.memory_space<vmem>>, %arg5: memref<8x1xf32, #tpu.memory_space<vmem>>, %arg6: memref<4x24xbf16, #tpu.memory_space<vmem>>, %arg7: memref<4x1xf32, #tpu.memory_space<vmem>>, %arg8: memref<4x16x128xbf16, #tpu.memory_space<vmem>>, %arg9: memref<1x128xf32, #tpu.memory_space<vmem>>, %arg10: memref<128x128xf32, #tpu.memory_space<vmem>>, %arg11: memref<1x128xf32, #tpu.memory_space<vmem>>, %arg12: memref<128x128xf32, #tpu.memory_space<vmem>>, %arg13: memref<1x128xf32, #tpu.memory_space<vmem>>, %arg14: memref<128x128xf32, #tpu.memory_space<vmem>>, %arg15: memref<1x128xf32, #tpu.memory_space<vmem>>, %arg16: memref<2x128xf32, #tpu.memory_space<vmem>>, %arg17: memref<4x2x16xbf16, #tpu.memory_space<vmem>>) attributes {dimension_semantics = [#tpu.dimension_semantics<parallel>], iteration_bounds = array<i64: 1>, scalar_prefetch = 0 : i64, scratch_operands = 1 : i64, tpu.core_type = #tpu.core_type<tc>, window_params = [{transform_indices = @transform_0, window_bounds = array<i64: 2, 4, 16>}, {pipeline_mode = #tpu.pipeline_mode<synchronous>, transform_indices = @transform_1, window_bounds = array<i64: 16, 12>}, {pipeline_mode = #tpu.pipeline_mode<synchronous>, transform_indices = @transform_2, window_bounds = array<i64: 16, 1>}, {pipeline_mode = #tpu.pipeline_mode<synchronous>, transform_indices = @transform_3, window_bounds = array<i64: 8, 80>}, {pipeline_mode = #tpu.pipeline_mode<synchronous>, transform_indices = @transform_4, window_bounds = array<i64: 8, 1>}, {pipeline_mode = #tpu.pipeline_mode<synchronous>, transform_indices = @transform_5, window_bounds = array<i64: 4, 24>}, {pipeline_mode = #tpu.pipeline_mode<synchronous>, transform_indices = @transform_6, window_bounds = array<i64: 4, 1>}, {pipeline_mode = #tpu.pipeline_mode<synchronous>, transform_indices = @transform_7, window_bounds = array<i64: 4, 16, 128>}, {pipeline_mode = #tpu.pipeline_mode<synchronous>, transform_indices = @transform_8, window_bounds = array<i64: 1, 128>}, {pipeline_mode = #tpu.pipeline_mode<synchronous>, transform_indices = @transform_9, window_bounds = array<i64: 128, 128>}, {pipeline_mode = #tpu.pipeline_mode<synchronous>, transform_indices = @transform_10, window_bounds = array<i64: 1, 128>}, {pipeline_mode = #tpu.pipeline_mode<synchronous>, transform_indices = @transform_11, window_bounds = array<i64: 128, 128>}, {pipeline_mode = #tpu.pipeline_mode<synchronous>, transform_indices = @transform_12, window_bounds = array<i64: 1, 128>}, {pipeline_mode = #tpu.pipeline_mode<synchronous>, transform_indices = @transform_13, window_bounds = array<i64: 128, 128>}, {pipeline_mode = #tpu.pipeline_mode<synchronous>, transform_indices = @transform_14, window_bounds = array<i64: 1, 128>}, {transform_indices = @transform_15, window_bounds = array<i64: 2, 128>}]} {
    %c0 = arith.constant 0 : index
    %c0_0 = arith.constant 0 : index
    %c0_1 = arith.constant 0 : index
    %0 = vector.load %arg1[%c0, %c0_0, %c0_1] : memref<2x4x16xf32, #tpu.memory_space<vmem>>, vector<1x4x16xf32>
    %1 = vector.shape_cast %0 : vector<1x4x16xf32> to vector<4x16xf32>
    %2 = arith.truncf %1 : vector<4x16xf32> to vector<4x16xbf16>
    %c0_2 = arith.constant 0 : index
    %c0_3 = arith.constant 0 : index
    %3 = vector.load %arg2[%c0_2, %c0_3] : memref<16x12xbf16, #tpu.memory_space<vmem>>, vector<16x12xbf16>
    %c0_4 = arith.constant 0 : index
    %c0_5 = arith.constant 0 : index
    %4 = vector.load %arg3[%c0_4, %c0_5] : memref<16x1xf32, #tpu.memory_space<vmem>>, vector<16x1xf32>
    %cst = arith.constant 0.000000e+00 : bf16
    %5 = vector.broadcast %cst : bf16 to vector<4x1xbf16>
    %cst_6 = arith.constant 0.000000e+00 : bf16
    %6 = vector.broadcast %cst_6 : bf16 to vector<4x1xbf16>
    %7 = tpu.concatenate %5, %2, %6 in 1 : vector<4x1xbf16>, vector<4x16xbf16>, vector<4x1xbf16> -> vector<4x18xbf16>
    %8 = vector.extract_strided_slice %7 {offsets = [0, 0], sizes = [4, 16], strides = [1, 1]} : vector<4x18xbf16> to vector<4x16xbf16>
    %9 = vector.extract_strided_slice %7 {offsets = [0, 1], sizes = [4, 16], strides = [1, 1]} : vector<4x18xbf16> to vector<4x16xbf16>
    %10 = vector.extract_strided_slice %7 {offsets = [0, 2], sizes = [4, 16], strides = [1, 1]} : vector<4x18xbf16> to vector<4x16xbf16>
    %11 = tpu.concatenate %8, %9, %10 in 0 : vector<4x16xbf16>, vector<4x16xbf16>, vector<4x16xbf16> -> vector<12x16xbf16>
    %cst_7 = arith.constant dense<0.000000e+00> : vector<16x16xf32>
    %12 = tpu.matmul %3, %11, %cst_7 {dimension_numbers = #tpu.dot_dimension_numbers<[1], [0], [0], [1], [0, 0, 1, 1], [], []>} : vector<16x12xbf16>, vector<12x16xbf16>, vector<16x16xf32> -> vector<16x16xf32>
    %13 = vector.broadcast %4 : vector<16x1xf32> to vector<16x16xf32>
    %14 = arith.addf %12, %13 : vector<16x16xf32>
    %cst_8 = arith.constant 0.000000e+00 : f32
    %15 = vector.broadcast %cst_8 : f32 to vector<16x16xf32>
    %16 = arith.maximumf %14, %15 : vector<16x16xf32>
    %17 = arith.truncf %16 : vector<16x16xf32> to vector<16x16xbf16>
    %c0_9 = arith.constant 0 : index
    %c0_10 = arith.constant 0 : index
    %18 = vector.load %arg4[%c0_9, %c0_10] : memref<8x80xbf16, #tpu.memory_space<vmem>>, vector<8x80xbf16>
    %c0_11 = arith.constant 0 : index
    %c0_12 = arith.constant 0 : index
    %19 = vector.load %arg5[%c0_11, %c0_12] : memref<8x1xf32, #tpu.memory_space<vmem>>, vector<8x1xf32>
    %cst_13 = arith.constant 0.000000e+00 : bf16
    %20 = vector.broadcast %cst_13 : bf16 to vector<16x2xbf16>
    %cst_14 = arith.constant 0.000000e+00 : bf16
    %21 = vector.broadcast %cst_14 : bf16 to vector<16x2xbf16>
    %22 = tpu.concatenate %20, %17, %21 in 1 : vector<16x2xbf16>, vector<16x16xbf16>, vector<16x2xbf16> -> vector<16x20xbf16>
    %23 = vector.extract_strided_slice %22 {offsets = [0, 0], sizes = [16, 16], strides = [1, 1]} : vector<16x20xbf16> to vector<16x16xbf16>
    %24 = vector.extract_strided_slice %22 {offsets = [0, 1], sizes = [16, 16], strides = [1, 1]} : vector<16x20xbf16> to vector<16x16xbf16>
    %25 = vector.extract_strided_slice %22 {offsets = [0, 2], sizes = [16, 16], strides = [1, 1]} : vector<16x20xbf16> to vector<16x16xbf16>
    %26 = vector.extract_strided_slice %22 {offsets = [0, 3], sizes = [16, 16], strides = [1, 1]} : vector<16x20xbf16> to vector<16x16xbf16>
    %27 = vector.extract_strided_slice %22 {offsets = [0, 4], sizes = [16, 16], strides = [1, 1]} : vector<16x20xbf16> to vector<16x16xbf16>
    %28 = tpu.concatenate %23, %24, %25, %26, %27 in 0 : vector<16x16xbf16>, vector<16x16xbf16>, vector<16x16xbf16>, vector<16x16xbf16>, vector<16x16xbf16> -> vector<80x16xbf16>
    %cst_15 = arith.constant dense<0.000000e+00> : vector<8x16xf32>
    %29 = tpu.matmul %18, %28, %cst_15 {dimension_numbers = #tpu.dot_dimension_numbers<[1], [0], [0], [1], [0, 0, 1, 1], [], []>} : vector<8x80xbf16>, vector<80x16xbf16>, vector<8x16xf32> -> vector<8x16xf32>
    %30 = vector.broadcast %19 : vector<8x1xf32> to vector<8x16xf32>
    %31 = arith.addf %29, %30 : vector<8x16xf32>
    %cst_16 = arith.constant 0.000000e+00 : f32
    %32 = vector.broadcast %cst_16 : f32 to vector<8x16xf32>
    %33 = arith.maximumf %31, %32 : vector<8x16xf32>
    %34 = arith.truncf %33 : vector<8x16xf32> to vector<8x16xbf16>
    %c0_17 = arith.constant 0 : index
    %c0_18 = arith.constant 0 : index
    %35 = vector.load %arg6[%c0_17, %c0_18] : memref<4x24xbf16, #tpu.memory_space<vmem>>, vector<4x24xbf16>
    %c0_19 = arith.constant 0 : index
    %c0_20 = arith.constant 0 : index
    %36 = vector.load %arg7[%c0_19, %c0_20] : memref<4x1xf32, #tpu.memory_space<vmem>>, vector<4x1xf32>
    %cst_21 = arith.constant 0.000000e+00 : bf16
    %37 = vector.broadcast %cst_21 : bf16 to vector<8x1xbf16>
    %cst_22 = arith.constant 0.000000e+00 : bf16
    %38 = vector.broadcast %cst_22 : bf16 to vector<8x1xbf16>
    %39 = tpu.concatenate %37, %34, %38 in 1 : vector<8x1xbf16>, vector<8x16xbf16>, vector<8x1xbf16> -> vector<8x18xbf16>
    %40 = vector.extract_strided_slice %39 {offsets = [0, 0], sizes = [8, 16], strides = [1, 1]} : vector<8x18xbf16> to vector<8x16xbf16>
    %41 = vector.extract_strided_slice %39 {offsets = [0, 1], sizes = [8, 16], strides = [1, 1]} : vector<8x18xbf16> to vector<8x16xbf16>
    %42 = vector.extract_strided_slice %39 {offsets = [0, 2], sizes = [8, 16], strides = [1, 1]} : vector<8x18xbf16> to vector<8x16xbf16>
    %43 = tpu.concatenate %40, %41, %42 in 0 : vector<8x16xbf16>, vector<8x16xbf16>, vector<8x16xbf16> -> vector<24x16xbf16>
    %cst_23 = arith.constant dense<0.000000e+00> : vector<4x16xf32>
    %44 = tpu.matmul %35, %43, %cst_23 {dimension_numbers = #tpu.dot_dimension_numbers<[1], [0], [0], [1], [0, 0, 1, 1], [], []>} : vector<4x24xbf16>, vector<24x16xbf16>, vector<4x16xf32> -> vector<4x16xf32>
    %45 = vector.broadcast %36 : vector<4x1xf32> to vector<4x16xf32>
    %46 = arith.addf %44, %45 : vector<4x16xf32>
    %cst_24 = arith.constant 0.000000e+00 : f32
    %47 = vector.broadcast %cst_24 : f32 to vector<4x16xf32>
    %48 = arith.maximumf %46, %47 : vector<4x16xf32>
    %49 = arith.truncf %48 : vector<4x16xf32> to vector<4x16xbf16>
    %50 = vector.shape_cast %49 : vector<4x16xbf16> to vector<4x1x16xbf16>
    %c0_25 = arith.constant 0 : index
    %c0_26 = arith.constant 0 : index
    %c0_27 = arith.constant 0 : index
    %51 = vector.load %arg17[%c0_25, %c0_26, %c0_27] : memref<4x2x16xbf16, #tpu.memory_space<vmem>>, vector<4x1x16xbf16>
    tpu.vector_store %arg17[%c0_25, %c0_26, %c0_27], %50 {strides = array<i32>} : memref<4x2x16xbf16, #tpu.memory_space<vmem>>, vector<4x1x16xbf16>,
    %c1 = arith.constant 1 : index
    %c0_28 = arith.constant 0 : index
    %c0_29 = arith.constant 0 : index
    %52 = vector.load %arg1[%c1, %c0_28, %c0_29] : memref<2x4x16xf32, #tpu.memory_space<vmem>>, vector<1x4x16xf32>
    %53 = vector.shape_cast %52 : vector<1x4x16xf32> to vector<4x16xf32>
    %54 = arith.truncf %53 : vector<4x16xf32> to vector<4x16xbf16>
    %c0_30 = arith.constant 0 : index
    %c0_31 = arith.constant 0 : index
    %55 = vector.load %arg2[%c0_30, %c0_31] : memref<16x12xbf16, #tpu.memory_space<vmem>>, vector<16x12xbf16>
    %c0_32 = arith.constant 0 : index
    %c0_33 = arith.constant 0 : index
    %56 = vector.load %arg3[%c0_32, %c0_33] : memref<16x1xf32, #tpu.memory_space<vmem>>, vector<16x1xf32>
    %cst_34 = arith.constant 0.000000e+00 : bf16
    %57 = vector.broadcast %cst_34 : bf16 to vector<4x1xbf16>
    %cst_35 = arith.constant 0.000000e+00 : bf16
    %58 = vector.broadcast %cst_35 : bf16 to vector<4x1xbf16>
    %59 = tpu.concatenate %57, %54, %58 in 1 : vector<4x1xbf16>, vector<4x16xbf16>, vector<4x1xbf16> -> vector<4x18xbf16>
    %60 = vector.extract_strided_slice %59 {offsets = [0, 0], sizes = [4, 16], strides = [1, 1]} : vector<4x18xbf16> to vector<4x16xbf16>
    %61 = vector.extract_strided_slice %59 {offsets = [0, 1], sizes = [4, 16], strides = [1, 1]} : vector<4x18xbf16> to vector<4x16xbf16>
    %62 = vector.extract_strided_slice %59 {offsets = [0, 2], sizes = [4, 16], strides = [1, 1]} : vector<4x18xbf16> to vector<4x16xbf16>
    %63 = tpu.concatenate %60, %61, %62 in 0 : vector<4x16xbf16>, vector<4x16xbf16>, vector<4x16xbf16> -> vector<12x16xbf16>
    %cst_36 = arith.constant dense<0.000000e+00> : vector<16x16xf32>
    %64 = tpu.matmul %55, %63, %cst_36 {dimension_numbers = #tpu.dot_dimension_numbers<[1], [0], [0], [1], [0, 0, 1, 1], [], []>} : vector<16x12xbf16>, vector<12x16xbf16>, vector<16x16xf32> -> vector<16x16xf32>
    %65 = vector.broadcast %56 : vector<16x1xf32> to vector<16x16xf32>
    %66 = arith.addf %64, %65 : vector<16x16xf32>
    %cst_37 = arith.constant 0.000000e+00 : f32
    %67 = vector.broadcast %cst_37 : f32 to vector<16x16xf32>
    %68 = arith.maximumf %66, %67 : vector<16x16xf32>
    %69 = arith.truncf %68 : vector<16x16xf32> to vector<16x16xbf16>
    %c0_38 = arith.constant 0 : index
    %c0_39 = arith.constant 0 : index
    %70 = vector.load %arg4[%c0_38, %c0_39] : memref<8x80xbf16, #tpu.memory_space<vmem>>, vector<8x80xbf16>
    %c0_40 = arith.constant 0 : index
    %c0_41 = arith.constant 0 : index
    %71 = vector.load %arg5[%c0_40, %c0_41] : memref<8x1xf32, #tpu.memory_space<vmem>>, vector<8x1xf32>
    %cst_42 = arith.constant 0.000000e+00 : bf16
    %72 = vector.broadcast %cst_42 : bf16 to vector<16x2xbf16>
    %cst_43 = arith.constant 0.000000e+00 : bf16
    %73 = vector.broadcast %cst_43 : bf16 to vector<16x2xbf16>
    %74 = tpu.concatenate %72, %69, %73 in 1 : vector<16x2xbf16>, vector<16x16xbf16>, vector<16x2xbf16> -> vector<16x20xbf16>
    %75 = vector.extract_strided_slice %74 {offsets = [0, 0], sizes = [16, 16], strides = [1, 1]} : vector<16x20xbf16> to vector<16x16xbf16>
    %76 = vector.extract_strided_slice %74 {offsets = [0, 1], sizes = [16, 16], strides = [1, 1]} : vector<16x20xbf16> to vector<16x16xbf16>
    %77 = vector.extract_strided_slice %74 {offsets = [0, 2], sizes = [16, 16], strides = [1, 1]} : vector<16x20xbf16> to vector<16x16xbf16>
    %78 = vector.extract_strided_slice %74 {offsets = [0, 3], sizes = [16, 16], strides = [1, 1]} : vector<16x20xbf16> to vector<16x16xbf16>
    %79 = vector.extract_strided_slice %74 {offsets = [0, 4], sizes = [16, 16], strides = [1, 1]} : vector<16x20xbf16> to vector<16x16xbf16>
    %80 = tpu.concatenate %75, %76, %77, %78, %79 in 0 : vector<16x16xbf16>, vector<16x16xbf16>, vector<16x16xbf16>, vector<16x16xbf16>, vector<16x16xbf16> -> vector<80x16xbf16>
    %cst_44 = arith.constant dense<0.000000e+00> : vector<8x16xf32>
    %81 = tpu.matmul %70, %80, %cst_44 {dimension_numbers = #tpu.dot_dimension_numbers<[1], [0], [0], [1], [0, 0, 1, 1], [], []>} : vector<8x80xbf16>, vector<80x16xbf16>, vector<8x16xf32> -> vector<8x16xf32>
    %82 = vector.broadcast %71 : vector<8x1xf32> to vector<8x16xf32>
    %83 = arith.addf %81, %82 : vector<8x16xf32>
    %cst_45 = arith.constant 0.000000e+00 : f32
    %84 = vector.broadcast %cst_45 : f32 to vector<8x16xf32>
    %85 = arith.maximumf %83, %84 : vector<8x16xf32>
    %86 = arith.truncf %85 : vector<8x16xf32> to vector<8x16xbf16>
    %c0_46 = arith.constant 0 : index
    %c0_47 = arith.constant 0 : index
    %87 = vector.load %arg6[%c0_46, %c0_47] : memref<4x24xbf16, #tpu.memory_space<vmem>>, vector<4x24xbf16>
    %c0_48 = arith.constant 0 : index
    %c0_49 = arith.constant 0 : index
    %88 = vector.load %arg7[%c0_48, %c0_49] : memref<4x1xf32, #tpu.memory_space<vmem>>, vector<4x1xf32>
    %cst_50 = arith.constant 0.000000e+00 : bf16
    %89 = vector.broadcast %cst_50 : bf16 to vector<8x1xbf16>
    %cst_51 = arith.constant 0.000000e+00 : bf16
    %90 = vector.broadcast %cst_51 : bf16 to vector<8x1xbf16>
    %91 = tpu.concatenate %89, %86, %90 in 1 : vector<8x1xbf16>, vector<8x16xbf16>, vector<8x1xbf16> -> vector<8x18xbf16>
    %92 = vector.extract_strided_slice %91 {offsets = [0, 0], sizes = [8, 16], strides = [1, 1]} : vector<8x18xbf16> to vector<8x16xbf16>
    %93 = vector.extract_strided_slice %91 {offsets = [0, 1], sizes = [8, 16], strides = [1, 1]} : vector<8x18xbf16> to vector<8x16xbf16>
    %94 = vector.extract_strided_slice %91 {offsets = [0, 2], sizes = [8, 16], strides = [1, 1]} : vector<8x18xbf16> to vector<8x16xbf16>
    %95 = tpu.concatenate %92, %93, %94 in 0 : vector<8x16xbf16>, vector<8x16xbf16>, vector<8x16xbf16> -> vector<24x16xbf16>
    %cst_52 = arith.constant dense<0.000000e+00> : vector<4x16xf32>
    %96 = tpu.matmul %87, %95, %cst_52 {dimension_numbers = #tpu.dot_dimension_numbers<[1], [0], [0], [1], [0, 0, 1, 1], [], []>} : vector<4x24xbf16>, vector<24x16xbf16>, vector<4x16xf32> -> vector<4x16xf32>
    %97 = vector.broadcast %88 : vector<4x1xf32> to vector<4x16xf32>
    %98 = arith.addf %96, %97 : vector<4x16xf32>
    %cst_53 = arith.constant 0.000000e+00 : f32
    %99 = vector.broadcast %cst_53 : f32 to vector<4x16xf32>
    %100 = arith.maximumf %98, %99 : vector<4x16xf32>
    %101 = arith.truncf %100 : vector<4x16xf32> to vector<4x16xbf16>
    %102 = vector.shape_cast %101 : vector<4x16xbf16> to vector<4x1x16xbf16>
    %c0_54 = arith.constant 0 : index
    %c1_55 = arith.constant 1 : index
    %c0_56 = arith.constant 0 : index
    %103 = vector.load %arg17[%c0_54, %c1_55, %c0_56] : memref<4x2x16xbf16, #tpu.memory_space<vmem>>, vector<4x1x16xbf16>
    tpu.vector_store %arg17[%c0_54, %c1_55, %c0_56], %102 {strides = array<i32>} : memref<4x2x16xbf16, #tpu.memory_space<vmem>>, vector<4x1x16xbf16>,
    %cst_57 = arith.constant 0.000000e+00 : f32
    %104 = vector.broadcast %cst_57 : f32 to vector<2x128xf32>
    %c0_i32 = arith.constant 0 : i32
    %105 = arith.index_cast %c0_i32 : i32 to index
    %c0_58 = arith.constant 0 : index
    %c0_59 = arith.constant 0 : index
    %106 = vector.load %arg17[%105, %c0_58, %c0_59] : memref<4x2x16xbf16, #tpu.memory_space<vmem>>, vector<1x2x16xbf16>
    %107 = vector.shape_cast %106 : vector<1x2x16xbf16> to vector<2x16xbf16>
    %108 = arith.index_cast %c0_i32 : i32 to index
    %c0_60 = arith.constant 0 : index
    %c0_61 = arith.constant 0 : index
    %109 = vector.load %arg8[%108, %c0_60, %c0_61] : memref<4x16x128xbf16, #tpu.memory_space<vmem>>, vector<1x16x128xbf16>
    %110 = vector.shape_cast %109 : vector<1x16x128xbf16> to vector<16x128xbf16>
    %cst_62 = arith.constant dense<0.000000e+00> : vector<2x128xf32>
    %111 = tpu.matmul %107, %110, %cst_62 {dimension_numbers = #tpu.dot_dimension_numbers<[1], [0], [0], [1], [0, 0, 1, 1], [], []>} : vector<2x16xbf16>, vector<16x128xbf16>, vector<2x128xf32> -> vector<2x128xf32>
    %112 = arith.addf %104, %111 : vector<2x128xf32>
    %c1_i32 = arith.constant 1 : i32
    %113 = arith.index_cast %c1_i32 : i32 to index
    %c0_63 = arith.constant 0 : index
    %c0_64 = arith.constant 0 : index
    %114 = vector.load %arg17[%113, %c0_63, %c0_64] : memref<4x2x16xbf16, #tpu.memory_space<vmem>>, vector<1x2x16xbf16>
    %115 = vector.shape_cast %114 : vector<1x2x16xbf16> to vector<2x16xbf16>
    %116 = arith.index_cast %c1_i32 : i32 to index
    %c0_65 = arith.constant 0 : index
    %c0_66 = arith.constant 0 : index
    %117 = vector.load %arg8[%116, %c0_65, %c0_66] : memref<4x16x128xbf16, #tpu.memory_space<vmem>>, vector<1x16x128xbf16>
    %118 = vector.shape_cast %117 : vector<1x16x128xbf16> to vector<16x128xbf16>
    %cst_67 = arith.constant dense<0.000000e+00> : vector<2x128xf32>
    %119 = tpu.matmul %115, %118, %cst_67 {dimension_numbers = #tpu.dot_dimension_numbers<[1], [0], [0], [1], [0, 0, 1, 1], [], []>} : vector<2x16xbf16>, vector<16x128xbf16>, vector<2x128xf32> -> vector<2x128xf32>
    %120 = arith.addf %112, %119 : vector<2x128xf32>
    %c2_i32 = arith.constant 2 : i32
    %121 = arith.index_cast %c2_i32 : i32 to index
    %c0_68 = arith.constant 0 : index
    %c0_69 = arith.constant 0 : index
    %122 = vector.load %arg17[%121, %c0_68, %c0_69] : memref<4x2x16xbf16, #tpu.memory_space<vmem>>, vector<1x2x16xbf16>
    %123 = vector.shape_cast %122 : vector<1x2x16xbf16> to vector<2x16xbf16>
    %124 = arith.index_cast %c2_i32 : i32 to index
    %c0_70 = arith.constant 0 : index
    %c0_71 = arith.constant 0 : index
    %125 = vector.load %arg8[%124, %c0_70, %c0_71] : memref<4x16x128xbf16, #tpu.memory_space<vmem>>, vector<1x16x128xbf16>
    %126 = vector.shape_cast %125 : vector<1x16x128xbf16> to vector<16x128xbf16>
    %cst_72 = arith.constant dense<0.000000e+00> : vector<2x128xf32>
    %127 = tpu.matmul %123, %126, %cst_72 {dimension_numbers = #tpu.dot_dimension_numbers<[1], [0], [0], [1], [0, 0, 1, 1], [], []>} : vector<2x16xbf16>, vector<16x128xbf16>, vector<2x128xf32> -> vector<2x128xf32>
    %128 = arith.addf %120, %127 : vector<2x128xf32>
    %c3_i32 = arith.constant 3 : i32
    %129 = arith.index_cast %c3_i32 : i32 to index
    %c0_73 = arith.constant 0 : index
    %c0_74 = arith.constant 0 : index
    %130 = vector.load %arg17[%129, %c0_73, %c0_74] : memref<4x2x16xbf16, #tpu.memory_space<vmem>>, vector<1x2x16xbf16>
    %131 = vector.shape_cast %130 : vector<1x2x16xbf16> to vector<2x16xbf16>
    %132 = arith.index_cast %c3_i32 : i32 to index
    %c0_75 = arith.constant 0 : index
    %c0_76 = arith.constant 0 : index
    %133 = vector.load %arg8[%132, %c0_75, %c0_76] : memref<4x16x128xbf16, #tpu.memory_space<vmem>>, vector<1x16x128xbf16>
    %134 = vector.shape_cast %133 : vector<1x16x128xbf16> to vector<16x128xbf16>
    %cst_77 = arith.constant dense<0.000000e+00> : vector<2x128xf32>
    %135 = tpu.matmul %131, %134, %cst_77 {dimension_numbers = #tpu.dot_dimension_numbers<[1], [0], [0], [1], [0, 0, 1, 1], [], []>} : vector<2x16xbf16>, vector<16x128xbf16>, vector<2x128xf32> -> vector<2x128xf32>
    %136 = arith.addf %128, %135 : vector<2x128xf32>
    %c4_i32 = arith.constant 4 : i32
    %c0_78 = arith.constant 0 : index
    %c0_79 = arith.constant 0 : index
    %137 = vector.load %arg9[%c0_78, %c0_79] : memref<1x128xf32, #tpu.memory_space<vmem>>, vector<1x128xf32>
    %c0_80 = arith.constant 0 : index
    %c0_81 = arith.constant 0 : index
    %138 = vector.load %arg10[%c0_80, %c0_81] : memref<128x128xf32, #tpu.memory_space<vmem>>, vector<128x128xf32>
    %c0_82 = arith.constant 0 : index
    %c0_83 = arith.constant 0 : index
    %139 = vector.load %arg11[%c0_82, %c0_83] : memref<1x128xf32, #tpu.memory_space<vmem>>, vector<1x128xf32>
    %c0_84 = arith.constant 0 : index
    %c0_85 = arith.constant 0 : index
    %140 = vector.load %arg12[%c0_84, %c0_85] : memref<128x128xf32, #tpu.memory_space<vmem>>, vector<128x128xf32>
    %c0_86 = arith.constant 0 : index
    %c0_87 = arith.constant 0 : index
    %141 = vector.load %arg13[%c0_86, %c0_87] : memref<1x128xf32, #tpu.memory_space<vmem>>, vector<1x128xf32>
    %c0_88 = arith.constant 0 : index
    %c0_89 = arith.constant 0 : index
    %142 = vector.load %arg14[%c0_88, %c0_89] : memref<128x128xf32, #tpu.memory_space<vmem>>, vector<128x128xf32>
    %c0_90 = arith.constant 0 : index
    %c0_91 = arith.constant 0 : index
    %143 = vector.load %arg15[%c0_90, %c0_91] : memref<1x128xf32, #tpu.memory_space<vmem>>, vector<1x128xf32>
    %144 = vector.broadcast %137 : vector<1x128xf32> to vector<2x128xf32>
    %145 = arith.addf %136, %144 : vector<2x128xf32>
    %cst_92 = arith.constant 0.000000e+00 : f32
    %146 = vector.broadcast %cst_92 : f32 to vector<2x128xf32>
    %147 = arith.maximumf %145, %146 : vector<2x128xf32>
    %cst_93 = arith.constant dense<0.000000e+00> : vector<2x128xf32>
    %148 = tpu.matmul %147, %138, %cst_93 {dimension_numbers = #tpu.dot_dimension_numbers<[1], [0], [0], [1], [0, 0, 1, 1], [], []>} : vector<2x128xf32>, vector<128x128xf32>, vector<2x128xf32> -> vector<2x128xf32>
    %149 = vector.broadcast %139 : vector<1x128xf32> to vector<2x128xf32>
    %150 = arith.addf %148, %149 : vector<2x128xf32>
    %cst_94 = arith.constant 0.000000e+00 : f32
    %151 = vector.broadcast %cst_94 : f32 to vector<2x128xf32>
    %152 = arith.cmpf ogt, %150, %151 : vector<2x128xf32>
    %cst_95 = arith.constant 0.00999999977 : f32
    %153 = vector.broadcast %cst_95 : f32 to vector<2x128xf32>
    %154 = arith.mulf %153, %150 : vector<2x128xf32>
    %155 = arith.select %152, %150, %154 : vector<2x128xi1>, vector<2x128xf32>
    %cst_96 = arith.constant dense<0.000000e+00> : vector<2x128xf32>
    %156 = tpu.matmul %155, %140, %cst_96 {dimension_numbers = #tpu.dot_dimension_numbers<[1], [0], [0], [1], [0, 0, 1, 1], [], []>} : vector<2x128xf32>, vector<128x128xf32>, vector<2x128xf32> -> vector<2x128xf32>
    %157 = vector.broadcast %141 : vector<1x128xf32> to vector<2x128xf32>
    %158 = arith.addf %156, %157 : vector<2x128xf32>
    %cst_97 = arith.constant 0.000000e+00 : f32
    %159 = vector.broadcast %cst_97 : f32 to vector<2x128xf32>
    %160 = arith.maximumf %158, %159 : vector<2x128xf32>
    %cst_98 = arith.constant dense<0.000000e+00> : vector<2x128xf32>
    %161 = tpu.matmul %160, %142, %cst_98 {dimension_numbers = #tpu.dot_dimension_numbers<[1], [0], [0], [1], [0, 0, 1, 1], [], []>} : vector<2x128xf32>, vector<128x128xf32>, vector<2x128xf32> -> vector<2x128xf32>
    %162 = vector.broadcast %143 : vector<1x128xf32> to vector<2x128xf32>
    %163 = arith.addf %161, %162 : vector<2x128xf32>
    %cst_99 = arith.constant 0.000000e+00 : f32
    %164 = vector.broadcast %cst_99 : f32 to vector<2x128xf32>
    %165 = arith.maximumf %163, %164 : vector<2x128xf32>
    %166 = tpu.iota {dimensions = array<i32: 1>} : vector<2x128xi32>
    %c8_i32 = arith.constant 8 : i32
    %167 = vector.broadcast %c8_i32 : i32 to vector<2x128xi32>
    %168 = arith.cmpi slt, %166, %167 : vector<2x128xi32>
    %cst_100 = arith.constant -1.000000e+30 : f32
    %169 = vector.broadcast %cst_100 : f32 to vector<2x128xf32>
    %170 = arith.select %168, %165, %169 : vector<2x128xi1>, vector<2x128xf32>
    %cst_101 = arith.constant dense<0xFF800000> : vector<2xf32>
    %171 = vector.multi_reduction <maximumf>, %170, %cst_101 [1] : vector<2x128xf32> to vector<2xf32>
    %172 = vector.shape_cast %171 : vector<2xf32> to vector<2x1xf32>
    %173 = vector.broadcast %172 : vector<2x1xf32> to vector<2x128xf32>
    %174 = arith.subf %170, %173 : vector<2x128xf32>
    %175 = math.exp %174 : vector<2x128xf32>
    %cst_102 = arith.constant dense<0.000000e+00> : vector<2xf32>
    %176 = vector.multi_reduction <add>, %175, %cst_102 [1] : vector<2x128xf32> to vector<2xf32>
    %177 = vector.shape_cast %176 : vector<2xf32> to vector<2x1xf32>
    %178 = tpu.reciprocal %177 : vector<2x1xf32> -> vector<2x1xf32>
    %179 = vector.broadcast %178 : vector<2x1xf32> to vector<2x128xf32>
    %180 = arith.mulf %175, %179 : vector<2x128xf32>
    %c0_103 = arith.constant 0 : index
    %c0_104 = arith.constant 0 : index
    %181 = vector.load %arg16[%c0_103, %c0_104] : memref<2x128xf32, #tpu.memory_space<vmem>>, vector<2x128xf32>
    tpu.vector_store %arg16[%c0_103, %c0_104], %180 {strides = array<i32>} : memref<2x128xf32, #tpu.memory_space<vmem>>, vector<2x128xf32>,
    return
  }
  func.func @transform_0(%arg0: i32) -> (i32, i32, i32) {
    %c0_i32 = arith.constant 0 : i32
    %c0_i32_0 = arith.constant 0 : i32
    %c0_i32_1 = arith.constant 0 : i32
    return %arg0, %c0_i32, %c0_i32_0 : i32, i32, i32
  }
  func.func @transform_1(%arg0: i32) -> (i32, i32) {
    %c0_i32 = arith.constant 0 : i32
    %c0_i32_0 = arith.constant 0 : i32
    %c0_i32_1 = arith.constant 0 : i32
    return %c0_i32, %c0_i32_0 : i32, i32
  }
  func.func @transform_2(%arg0: i32) -> (i32, i32) {
    %c0_i32 = arith.constant 0 : i32
    %c0_i32_0 = arith.constant 0 : i32
    %c0_i32_1 = arith.constant 0 : i32
    return %c0_i32, %c0_i32_0 : i32, i32
  }
  func.func @transform_3(%arg0: i32) -> (i32, i32) {
    %c0_i32 = arith.constant 0 : i32
    %c0_i32_0 = arith.constant 0 : i32
    %c0_i32_1 = arith.constant 0 : i32
    return %c0_i32, %c0_i32_0 : i32, i32
  }
  func.func @transform_4(%arg0: i32) -> (i32, i32) {
    %c0_i32 = arith.constant 0 : i32
    %c0_i32_0 = arith.constant 0 : i32
    %c0_i32_1 = arith.constant 0 : i32
    return %c0_i32, %c0_i32_0 : i32, i32
  }
  func.func @transform_5(%arg0: i32) -> (i32, i32) {
    %c0_i32 = arith.constant 0 : i32
    %c0_i32_0 = arith.constant 0 : i32
    %c0_i32_1 = arith.constant 0 : i32
    return %c0_i32, %c0_i32_0 : i32, i32
  }
  func.func @transform_6(%arg0: i32) -> (i32, i32) {
    %c0_i32 = arith.constant 0 : i32
    %c0_i32_0 = arith.constant 0 : i32
    %c0_i32_1 = arith.constant 0 : i32
    return %c0_i32, %c0_i32_0 : i32, i32
  }
  func.func @transform_7(%arg0: i32) -> (i32, i32, i32) {
    %c0_i32 = arith.constant 0 : i32
    %c0_i32_0 = arith.constant 0 : i32
    %c0_i32_1 = arith.constant 0 : i32
    %c0_i32_2 = arith.constant 0 : i32
    return %c0_i32, %c0_i32_0, %c0_i32_1 : i32, i32, i32
  }
  func.func @transform_8(%arg0: i32) -> (i32, i32) {
    %c0_i32 = arith.constant 0 : i32
    %c0_i32_0 = arith.constant 0 : i32
    %c0_i32_1 = arith.constant 0 : i32
    return %c0_i32, %c0_i32_0 : i32, i32
  }
  func.func @transform_9(%arg0: i32) -> (i32, i32) {
    %c0_i32 = arith.constant 0 : i32
    %c0_i32_0 = arith.constant 0 : i32
    %c0_i32_1 = arith.constant 0 : i32
    return %c0_i32, %c0_i32_0 : i32, i32
  }
  func.func @transform_10(%arg0: i32) -> (i32, i32) {
    %c0_i32 = arith.constant 0 : i32
    %c0_i32_0 = arith.constant 0 : i32
    %c0_i32_1 = arith.constant 0 : i32
    return %c0_i32, %c0_i32_0 : i32, i32
  }
  func.func @transform_11(%arg0: i32) -> (i32, i32) {
    %c0_i32 = arith.constant 0 : i32
    %c0_i32_0 = arith.constant 0 : i32
    %c0_i32_1 = arith.constant 0 : i32
    return %c0_i32, %c0_i32_0 : i32, i32
  }
  func.func @transform_12(%arg0: i32) -> (i32, i32) {
    %c0_i32 = arith.constant 0 : i32
    %c0_i32_0 = arith.constant 0 : i32
    %c0_i32_1 = arith.constant 0 : i32
    return %c0_i32, %c0_i32_0 : i32, i32
  }
  func.func @transform_13(%arg0: i32) -> (i32, i32) {
    %c0_i32 = arith.constant 0 : i32
    %c0_i32_0 = arith.constant 0 : i32
    %c0_i32_1 = arith.constant 0 : i32
    return %c0_i32, %c0_i32_0 : i32, i32
  }
  func.func @transform_14(%arg0: i32) -> (i32, i32) {
    %c0_i32 = arith.constant 0 : i32
    %c0_i32_0 = arith.constant 0 : i32
    %c0_i32_1 = arith.constant 0 : i32
    return %c0_i32, %c0_i32_0 : i32, i32
  }
  func.func @transform_15(%arg0: i32) -> (i32, i32) {
    %c0_i32 = arith.constant 0 : i32
    %c0_i32_0 = arith.constant 0 : i32
    return %arg0, %c0_i32 : i32, i32
  }
}

</mosaic_0001>

<bundles_post_ra>
// kernel: tpu_custom_call.1
= control target key start
LH: loop header
LB: loop body
LE: loop exit
PB: predicated region body
PF: predicated region fallthrough
CT: control target
= control target key end

     0   :  { %s1317_s0 = inlined_call_operand.hbm [shape: f32[2,4,16], index: 0, kind: input, shape index: {}]   ;;  %s1318_s1 = inlined_call_operand.hbm [shape: bf16[16,12], index: 1, kind: input, shape index: {}]   ;;  %s1319_s2 = inlined_call_operand.vmem [shape: f32[16,1], index: 2, kind: input, shape index: {}]   ;;  %s1320_s3 = inlined_call_operand.vmem [shape: bf16[8,80], index: 3, kind: input, shape index: {}]   ;;  %s1321_s4 = inlined_call_operand.vmem [shape: f32[8,1], index: 4, kind: input, shape index: {}]   ;;  %s1322_s5 = inlined_call_operand.hbm [shape: bf16[4,24], index: 5, kind: input, shape index: {}]   ;;  %s1323_s6 = inlined_call_operand.vmem [shape: f32[4,1], index: 6, kind: input, shape index: {}]   ;;  %s1324_s7 = inlined_call_operand.vmem [shape: bf16[4,16,128], index: 7, kind: input, shape index: {}]   ;;  %s1325_s8 = inlined_call_operand.vmem [shape: f32[1,128], index: 8, kind: input, shape index: {}]   ;;  %s1326_s9 = inlined_call_operand.hbm [shape: f32[128,128], index: 9, kind: input, shape index: {}]   ;;  %s1327_s10 = inlined_call_operand.vmem [shape: f32[1,128], index: 10, kind: input, shape index: {}]   ;;  %s1328_s11 = inlined_call_operand.hbm [shape: f32[128,128], index: 11, kind: input, shape index: {}]   ;;  %s1329_s12 = inlined_call_operand.vmem [shape: f32[1,128], index: 12, kind: input, shape index: {}]   ;;  %s1330_s13 = inlined_call_operand.hbm [shape: f32[128,128], index: 13, kind: input, shape index: {}]   ;;  %s1331_s14 = inlined_call_operand.vmem [shape: f32[1,128], index: 14, kind: input, shape index: {}]   ;;  %s1332_s15 = inlined_call_operand.hbm [shape: f32[2,128], index: 15, kind: output, shape index: {}]  }
   0x1   :  { %1333 = sst [smem:[#allocation20_spill]] %s1332_s15 }
   0x2   :  { %20 = vsyncpa [#allocation4], 0 }
   0x3   :  { %21 = vsyncpa [#allocation7], 0 }
   0x4   :  { %22 = vsyncpa [#allocation10], 0 }
   0x5   :  { %23 = vsyncpa [#allocation13], 0 }
   0x6   :  { %24 = vsyncpa [#allocation5], 0  ;;  %s42_s20 = sshll.u32 %s1318_s1, 4  ;;  %s1089_s21 = smov [#allocation6]   ;;  %s43_s20 = int_to_ptr.hbm [resolvable:$true] %s42_s20 }
   0x7   :  { %s44_s22 = sshll.u32 %s1089_s21, 4  ;;  %s78_s25 = sshll.u32 %s1326_s9, 4  ;;  %s45_s22 = int_to_ptr.vmem [resolvable:$true] %s44_s22  ;;  %s79_s25 = int_to_ptr.hbm [resolvable:$true] %s78_s25 }
   0x8   :  { %s1090_s26 = smov 64   ;;  %s1091_s27 = smov 4  }
   0x9   :  { %50 = dma.hbm_to_vmem [thread:$0]  %s43_s20, 128, %s45_s22, [#allocation7], %s1090_s26, %s1090_s26, %s1091_s27  }
   0xa   :  { %s1092_s28 = smov [#allocation9]   ;;  %s1093_s30 = smov 128  }
   0xb   :  { %s80_s29 = sshll.u32 %s1092_s28, 4  ;;  %s1094_s16 = smov 8   ;;  %s81_s29 = int_to_ptr.vmem [resolvable:$true] %s80_s29 }
   0xc   :  { %86 = dma.hbm_to_vmem [thread:$0]  %s79_s25, 2048, %s81_s29, [#allocation10], %s1093_s30, %s1093_s30, %s1094_s16  }
   0xd   :  { %s29_s18 = sshll.u32 %s1317_s0, 4  ;;  %s1095_s19 = smov [#allocation3]   ;;  %s30_s18 = int_to_ptr.hbm [resolvable:$true] %s29_s18 }
   0xe   :  { %s31_s21 = sshll.u32 %s1095_s19, 4  ;;  %s62_s24 = sshll.u32 %s1322_s5, 4  ;;  %s32_s21 = int_to_ptr.vmem [resolvable:$true] %s31_s21  ;;  %s63_s24 = int_to_ptr.hbm [resolvable:$true] %s62_s24 }
   0xf   :  { %37 = dma.hbm_to_vmem [thread:$0]  %s30_s18, 128, %s32_s21, [#allocation4], %s1090_s26, %s1090_s26, %s1091_s27  }
  0x10   :  { %s1096_s20 = smov [#allocation8]   ;;  %s93_s25 = sshll.u32 %s1328_s11, 4  ;;  %s94_s25 = int_to_ptr.hbm [resolvable:$true] %s93_s25 }
  0x11   :  { %s64_s22 = sshll.u32 %s1096_s20, 4  ;;  %s108_s17 = sshll.u32 %s1330_s13, 4  ;;  %s65_s22 = int_to_ptr.vmem [resolvable:$true] %s64_s22  ;;  %s109_s17 = int_to_ptr.hbm [resolvable:$true] %s108_s17 }
  0x12   :  { %67 = dma.hbm_to_vmem [thread:$0]  %s63_s24, 32, %s65_s22, [#allocation7]  }
  0x13   :  { %s1097_s1 = smov [#allocation11]   ;;  %s1098_s5 = smov [#allocation12]  }
  0x14   :  { %s95_s19 = sshll.u32 %s1097_s1, 4  ;;  %s110_s26 = sshll.u32 %s1098_s5, 4  ;;  %s96_s19 = int_to_ptr.vmem [resolvable:$true] %s95_s19  ;;  %s111_s26 = int_to_ptr.vmem [resolvable:$true] %s110_s26 }
  0x15   :  { %101 = dma.hbm_to_vmem [thread:$0]  %s94_s25, 2048, %s96_s19, [#allocation10], %s1093_s30, %s1093_s30, %s1094_s16  }
  0x16   :  { %116 = dma.hbm_to_vmem [thread:$0]  %s109_s17, 2048, %s111_s26, [#allocation13], %s1093_s30, %s1093_s30, %s1094_s16  }
  0x17   :  { %1079 = dma.done.wait [#allocation4], 128  }
  0x18   :  { %1080 = vsyncadd [#allocation4], 4294967168 }
  0x19   :  { %1081 = dma.done.wait [#allocation7], 160  }
  0x1a   :  { %1082 = vsyncadd [#allocation7], 4294967136 }
  0x1b   :  { %1083 = dma.done.wait [#allocation10], 4096  }
  0x1c   :  { %1084 = vsyncadd [#allocation10], 4294963200 }
  0x1d   :  { %1085 = dma.done.wait [#allocation13], 2048  }
  0x1e   :  { %1086 = vsyncadd [#allocation13], 4294965248  ;;  %v144_v0 = vld [vmem:[#allocation3] sm:$0xf]  ;;  %v351_v1 = vld [vmem:[#allocation3 + $0x4] sm:$0xf] }
  0x1f   :  { %v145_v2 = vpack.c.bf16 %v144_v0, %v144_v0  ;;  %v352_v4 = vpack.c.bf16 %v351_v1, %v351_v1  ;;  %s1099_s11 = smov 1   ;;  %vm155_vm0 = vcmask 7168   ;;  %vm159_vm1 = vcmask 138240   ;;  %s1100_s13 = smov 127   ;;  %v149_v18 = vld [vmem:[%s1319_s2 + $0x8] sm:$0xff]  ;;  %v148_v20 = vld [vmem:[%s1319_s2] sm:$0xff] }
  0x20   :  { %s1101_s15 = smov 126   ;;  %v1102_v19 = vmov 0   ;;  %vm168_vm2 = vcmask 1041408   ;;  %vm171_vm3 = vcmask 1043456   ;;  %vm193_vm4 = vcmask 1045504   ;;  %v877_v26 = vld [vmem:[#allocation6] sm:$0xff] }
  0x21   :  { %v151_v3 = vunpack.c.l.b16 %v145_v2  ;;  %v358_v6 = vunpack.c.l.b16 %v352_v4  ;;  %901 = vset.pattern.permute.xlu1 %v1102_v19  ;;  %900 = vset.pattern.permute.xlu0 %v1102_v19  ;;  %vm189_vm5 = vcmask 97280   ;;  %v876_v32 = vld [vmem:[#allocation6] sm:$0xff]  ;;  %s1103_s2 = smov 2   ;;  %vm223_vm6 = vcmask 15360   ;;  %s1104_s21 = smov 125   ;;  %v215_v1 = vld [vmem:[%s1321_s4] sm:$0xff] }
  0x22   :  { %902 = vset.pattern.permute.xlu2 %v1102_v19  ;;  %vm226_vm7 = vcmask 146432   ;;  %s1105_s23 = smov 124   ;;  %vm247_vm8 = vcmask 654336   ;;  %vm290_vm9 = vcmask 195584   ;;  %vm314_vm10 = vcmask 1040384  }
  0x23   :  { %v152_v5 = vpack.c.b16 %v151_v3, %v151_v3  ;;  %v359_v7 = vpack.c.b16 %v358_v6, %v358_v6  ;;  %vm319_vm11 = vcmask 1041409   ;;  %vm335_vm12 = vcmask 122880  }
  0x24   :  { %vm336_vm13 = vsmask.f32 256  ;;  %vm529_vm15 = vsmask.f32 7938 }
  0x25   :  { %153 = vrot.lane.b32.xlu0 %v152_v5, %s1099_s11  ;;  %vm1261_vm14 = vmand %vm335_vm12, %vm336_vm13 }
  0x2d   :  { %360 = vrot.lane.b32.xlu0 %v359_v7, %s1099_s11 }
  0x35   :  { %176 = vperm.xlu0 %900, %v148_v20  }
  0x97   :  { %v154_v8 = vpop.permute.xlu0 %153 }
  0x98   :  { %v158_v9 = vsel %vm155_vm0, 0, %v154_v8  ;;  %v214_v8 = vld [vmem:[%s1320_s3] sm:$0xf] }
  0x99   :  { %v160_v10 = vsel %vm159_vm1, %v158_v9, 0 }
  0x9a   :  { %v162_v11 = vrot.slane %v160_v10, 6  ;;  %v165_v15 = vrot.slane %v160_v10, 4 }
  0x9c   :  { %163 = vrot.lane.b32.xlu1 %v162_v11, %s1100_s13  ;;  %v414_v11 = vld [vmem:[%s1320_s3] sm:$0xf] }
  0x9f   :  { %v361_v12 = vpop.permute.xlu0 %360 }
  0xa0   :  { %v363_v13 = vsel %vm155_vm0, 0, %v361_v12 }
  0xa1   :  { %v364_v14 = vsel %vm159_vm1, %v363_v13, 0 }
  0xa2   :  { %v366_v16 = vrot.slane %v364_v14, 6  ;;  %v369_v17 = vrot.slane %v364_v14, 4 }
  0xa4   :  { %166 = vrot.lane.b32.xlu1 %v165_v15, %s1101_s15  ;;  %367 = vrot.lane.b32.xlu2 %v366_v16, %s1100_s13 }
  0xa7   :  { %v177_v42 = vpop.permute.xlu0 %176 }
  0xac   :  { %370 = vrot.lane.b32.xlu2 %v369_v17, %s1101_s15  ;;  %181 = vperm.xlu1 %901, %v149_v18  }
  0xb4   :  { %383 = vperm.xlu1 %901, %v149_v18   ;;  %378 = vperm.xlu2 %902, %v148_v20  }
  0xfe   :  { %v368_v21 = vpop.permute.xlu2 %367 }
  0xff   :  { %v373_v22 = vsel %vm168_vm2, %v364_v14, %v368_v21 }
 0x106   :  { %v371_v23 = vpop.permute.xlu2 %370 }
 0x107   :  { %v375_v24 = vsel %vm171_vm3, %v373_v22, %v371_v23 }
 0x108   :  { %v394_v25 = vsel %vm193_vm4, %v375_v24, 0 }
 0x109   :  { %403 = vmatpush.bf16.msra.mxu3 %v394_v25 }
 0x10c   :  { %845 = vmatmul.msk.bf16.vlgmr.msra.gmra.mxu3 %vm189_vm5, %v877_v26 }
 0x10e   :  { %v164_v27 = vpop.permute.xlu1 %163  ;;  %v379_v35 = vpop.permute.xlu2 %378 }
 0x10f   :  { %v170_v28 = vsel %vm168_vm2, %v160_v10, %v164_v27 }
 0x116   :  { %v167_v29 = vpop.permute.xlu1 %166 }
 0x117   :  { %v173_v30 = vsel %vm171_vm3, %v170_v28, %v167_v29 }
 0x118   :  { %v194_v31 = vsel %vm193_vm4, %v173_v30, 0 }
 0x119   :  { %203 = vmatpush.bf16.msra.mxu0 %v194_v31 }
 0x11c   :  { %836 = vmatmul.msk.bf16.vlgmr.msra.gmra.mxu0 %vm189_vm5, %v876_v32  ;;  %v267_v32 = vld [vmem:[%s1323_s6] sm:$0xf] }
 0x11e   :  { %v182_v33 = vpop.permute.xlu1 %181 }
 0x126   :  { %v384_v38 = vpop.permute.xlu1 %383 }
 0x18f   :  { %v405_v34 = vpop.f32.mrf.mxu3 }
 0x190   :  { %v406_v36 = vadd.f32 %v405_v34, %v379_v35 }
 0x192   :  { %v410_v37 = vmax.f32 %v406_v36, 0.0 }
 0x194   :  { %v412_v43 = vpack.c.bf16 %v410_v37, %v410_v37  ;;  %v464_v37 = vld [vmem:[%s1323_s6] sm:$0xf] }
 0x196   :  { %v418_v47 = vunpack.c.l.b16 %v412_v43 }
 0x197   :  { %v407_v39 = vpop.f32.mrf.mxu3 }
 0x198   :  { %v408_v40 = vadd.f32 %v407_v39, %v384_v38 }
 0x199   :  { %v205_v41 = vpop.f32.mrf.mxu0 }
 0x19a   :  { %v411_v44 = vmax.f32 %v408_v40, 0.0  ;;  %v206_v46 = vadd.f32 %v205_v41, %v177_v42  ;;  %v266_v42 = vld [vmem:[#allocation8] sm:$0x3] }
 0x19c   :  { %v413_v45 = vpack.c.bf16 %v411_v44, %v411_v44  ;;  %v210_v49 = vmax.f32 %v206_v46, 0.0 }
 0x19e   :  { %v419_v48 = vunpack.c.l.b16 %v413_v45  ;;  %v212_v53 = vpack.c.bf16 %v210_v49, %v210_v49 }
 0x1a0   :  { %v420_v50 = vpack.c.b16 %v419_v48, %v418_v47  ;;  %v218_v56 = vunpack.c.l.b16 %v212_v53  ;;  %v463_v47 = vld [vmem:[#allocation8] sm:$0x3] }
 0x1a1   :  { %v207_v51 = vpop.f32.mrf.mxu0 }
 0x1a2   :  { %v208_v52 = vadd.f32 %v207_v51, %v182_v33  ;;  %421 = vrot.lane.b32.xlu0 %v420_v50, %s1103_s2 }
 0x1a4   :  { %v211_v54 = vmax.f32 %v208_v52, 0.0 }
 0x1a6   :  { %v213_v55 = vpack.c.bf16 %v211_v54, %v211_v54 }
 0x1a8   :  { %v219_v57 = vunpack.c.l.b16 %v213_v55 }
 0x1aa   :  { %v220_v58 = vpack.c.b16 %v219_v57, %v218_v56  ;;  %v653_v57 = vld [vmem:[#allocation9] sm:$0xff] }
 0x1ac   :  { %221 = vrot.lane.b32.xlu2 %v220_v58, %s1103_s2  ;;  %v338_v58 = vld [vmem:[#allocation2] sm:$0x1] }
 0x206   :  { %v222_v59 = vpop.permute.xlu2 %221 }
 0x207   :  { %v225_v60 = vsel %vm223_vm6, 0, %v222_v59 }
 0x208   :  { %v227_v61 = vsel %vm226_vm7, %v225_v60, 0 }
 0x209   :  { %233 = vrot.lane.b32.xlu0 %v227_v61, %s1101_s15  ;;  %236 = vrot.lane.b32.xlu2 %v227_v61, %s1104_s21 }
 0x20a   :  { %239 = vrot.lane.b32.xlu1 %v227_v61, %s1105_s23 }
 0x211   :  { %230 = vrot.lane.b32.xlu2 %v227_v61, %s1100_s13 }
 0x214   :  { %v422_v62 = vpop.permute.xlu0 %421 }
 0x215   :  { %v424_v63 = vsel %vm223_vm6, 0, %v422_v62  ;;  %v341_v62 = vld [vmem:[#allocation2 + $0x1] sm:$0x1] }
 0x216   :  { %v425_v0 = vsel %vm226_vm7, %v424_v63, 0  ;;  %v344_v63 = vld [vmem:[#allocation2 + $0x2] sm:$0x1] }
 0x217   :  { %434 = vrot.lane.b32.xlu0 %v425_v0, %s1104_s21  ;;  %437 = vrot.lane.b32.xlu1 %v425_v0, %s1105_s23  ;;  %s1338_s23 = sld [smem:[#allocation20_spill]] }
 0x219   :  { %428 = vrot.lane.b32.xlu2 %v425_v0, %s1100_s13 }
 0x21d   :  { %s819_s9 = sshll.u32 %s1338_s23, 4  ;;  %s820_s9 = int_to_ptr.hbm [resolvable:$true] %s819_s9 }
 0x21f   :  { %244 = vperm.xlu0 %900, %v215_v1   ;;  %431 = vrot.lane.b32.xlu1 %v425_v0, %s1101_s15 }
 0x227   :  { %442 = vperm.xlu1 %901, %v215_v1  }
 0x263   :  { %v237_v3 = vpop.permute.xlu2 %236 }
 0x26b   :  { %v231_v5 = vpop.permute.xlu2 %230 }
 0x273   :  { %v429_v10 = vpop.permute.xlu2 %428 }
 0x27b   :  { %v234_v4 = vpop.permute.xlu0 %233 }
 0x27c   :  { %v240_v2 = vpop.permute.xlu1 %239 }
 0x27d   :  { %254 = vmatpush.bf16.msra.mxu1 %v240_v2 }
 0x281   :  { %255 = vmatpush.bf16.msra.mxu1 %v237_v3 }
 0x285   :  { %256 = vmatpush.bf16.msra.mxu1 %v234_v4  ;;  %v347_v4 = vld [vmem:[#allocation2 + $0x3] sm:$0x1] }
 0x289   :  { %257 = vmatpush.bf16.msra.mxu1 %v231_v5  ;;  %v438_v6 = vpop.permute.xlu1 %437  ;;  %v435_v7 = vpop.permute.xlu0 %434 }
 0x28a   :  { %451 = vmatpush.bf16.msrb.mxu0 %v438_v6 }
 0x28d   :  { %258 = vmatpush.bf16.msra.mxu1 %v227_v61 }
 0x28e   :  { %452 = vmatpush.bf16.msrb.mxu0 %v435_v7 }
 0x290   :  { %837 = vmatmul.msk.bf16.vlgmr.msra.gmra.mxu1 %vm247_vm8, %v214_v8 }
 0x291   :  { %v432_v9 = vpop.permute.xlu1 %431  ;;  %v245_v12 = vpop.permute.xlu0 %244 }
 0x292   :  { %453 = vmatpush.bf16.msrb.mxu0 %v432_v9  ;;  %v878_v9 = vld [vmem:[%s1324_s7] sm:$0xff] }
 0x296   :  { %454 = vmatpush.bf16.msrb.mxu0 %v429_v10  ;;  %v879_v10 = vld [vmem:[%s1324_s7 + $0x8] sm:$0xff] }
 0x299   :  { %v443_v20 = vpop.permute.xlu1 %442 }
 0x29a   :  { %455 = vmatpush.bf16.msrb.mxu0 %v425_v0 }
 0x29d   :  { %846 = vmatmul.msk.bf16.vlgmr.msrb.gmra.mxu0 %vm247_vm8, %v414_v11  ;;  %v880_v11 = vld [vmem:[%s1324_s7 + $0x10] sm:$0xff] }
 0x29e   :  { %590 = vmatpush.bf16.msra.mxu0 %v878_v9 }
 0x30d   :  { %v260_v13 = vpop.f32.mrf.mxu1 }
 0x30e   :  { %v261_v14 = vadd.f32 %v260_v13, %v245_v12  ;;  %v881_v12 = vld [vmem:[%s1324_s7 + $0x18] sm:$0xff] }
 0x30f   :  { %645 = vmatpush.bf16.msrb.mxu0 %v881_v12 }
 0x310   :  { %v264_v15 = vmax.f32 %v261_v14, 0.0 }
 0x312   :  { %v265_v16 = vpack.c.bf16 %v264_v15, %v264_v15 }
 0x314   :  { %v269_v17 = vunpack.c.l.b16 %v265_v16 }
 0x315   :  { %v262_v18 = vpop.f32.mrf.mxu1 }
 0x316   :  { %v270_v19 = vpack.c.b16 %v269_v17, %v269_v17  ;;  %v668_v18 = vld [vmem:[#allocation9 + $0x78] sm:$0xff] }
 0x318   :  { %271 = vrot.lane.b32.xlu2 %v270_v19, %s1099_s11  ;;  %v667_v19 = vld [vmem:[#allocation9 + $0x70] sm:$0xff] }
 0x31a   :  { %v457_v21 = vpop.f32.mrf.mxu0 }
 0x31b   :  { %v458_v22 = vadd.f32 %v457_v21, %v443_v20  ;;  %v666_v21 = vld [vmem:[#allocation9 + $0x68] sm:$0xff] }
 0x31d   :  { %v461_v23 = vmax.f32 %v458_v22, 0.0 }
 0x31f   :  { %v462_v24 = vpack.c.bf16 %v461_v23, %v461_v23 }
 0x321   :  { %v466_v25 = vunpack.c.l.b16 %v462_v24 }
 0x322   :  { %v459_v26 = vpop.f32.mrf.mxu0 }
 0x323   :  { %v467_v27 = vpack.c.b16 %v466_v25, %v466_v25  ;;  %v665_v26 = vld [vmem:[#allocation9 + $0x60] sm:$0xff]  ;;  %v701_v25 = vld [vmem:[#allocation12 + $0x70] sm:$0xff] }
 0x325   :  { %468 = vrot.lane.b32.xlu0 %v467_v27, %s1099_s11 }
 0x372   :  { %v272_v28 = vpop.permute.xlu2 %271 }
 0x373   :  { %v274_v29 = vsel %vm155_vm0, 0, %v272_v28 }
 0x374   :  { %v275_v30 = vsel %vm159_vm1, %v274_v29, 0 }
 0x375   :  { %v277_v31 = vrot.slane %v275_v30, 4  ;;  %280 = vrot.lane.b32.xlu1 %v275_v30, %s1101_s15 }
 0x377   :  { %278 = vrot.lane.b32.xlu2 %v277_v31, %s1100_s13 }
 0x37f   :  { %287 = vperm.xlu2 %902, %v267_v32  }
 0x397   :  { %v469_v33 = vpop.permute.xlu0 %468 }
 0x398   :  { %v471_v34 = vsel %vm155_vm0, 0, %v469_v33  ;;  %vm1288_vm0 = vmand %vm335_vm12, %vm529_vm15 }
 0x399   :  { %v472_v35 = vsel %vm159_vm1, %v471_v34, 0  ;;  %vm557_vm1 = vcmask 130048  }
 0x39a   :  { %v474_v36 = vrot.slane %v472_v35, 4  ;;  %477 = vrot.lane.b32.xlu0 %v472_v35, %s1101_s15 }
 0x39c   :  { %475 = vrot.lane.b32.xlu1 %v474_v36, %s1100_s13 }
 0x3a2   :  { %484 = vperm.xlu0 %900, %v464_v37  }
 0x3d1   :  { %v279_v40 = vpop.permute.xlu2 %278 }
 0x3d2   :  { %v283_v41 = vsel %vm171_vm3, %v275_v30, %v279_v40 }
 0x3d9   :  { %v288_v48 = vpop.permute.xlu2 %287 }
 0x3e7   :  { %v281_v38 = vpop.permute.xlu1 %280 }
 0x3e8   :  { %v295_v39 = vsel %vm171_vm3, %v281_v38, 0 }
 0x3e9   :  { %303 = vmatpush.bf16.msra.mxu2 %v295_v39 }
 0x3ed   :  { %304 = vmatpush.bf16.msra.mxu2 %v283_v41 }
 0x3f0   :  { %838 = vmatmul.msk.bf16.vlgmr.msra.gmra.mxu2 %vm290_vm9, %v266_v42 }
 0x3f1   :  { %568 = vmatpush.bf16.msrb.mxu2 %v879_v10  ;;  %v674_v10 = vld [vmem:[#allocation11 + $0x20] sm:$0xff] }
 0x3f5   :  { %712 = vmatpush.msra.mxu2 %v668_v18 }
 0x3f7   :  { %713 = vmatpush.msra.mxu2 %v667_v19 }
 0x3f9   :  { %714 = vmatpush.msra.mxu2 %v666_v21  ;;  %v672_v21 = vld [vmem:[#allocation11 + $0x10] sm:$0xff] }
 0x3fb   :  { %715 = vmatpush.msra.mxu2 %v665_v26  ;;  %v700_v26 = vld [vmem:[#allocation12 + $0x68] sm:$0xff] }
 0x40c   :  { %v478_v43 = vpop.permute.xlu0 %477 }
 0x40d   :  { %v491_v44 = vsel %vm171_vm3, %v478_v43, 0 }
 0x40e   :  { %499 = vmatpush.bf16.msrb.mxu3 %v491_v44  ;;  %v476_v45 = vpop.permute.xlu1 %475 }
 0x40f   :  { %v480_v46 = vsel %vm171_vm3, %v472_v35, %v476_v45 }
 0x412   :  { %500 = vmatpush.bf16.msrb.mxu3 %v480_v46  ;;  %v664_v46 = vld [vmem:[#allocation9 + $0x58] sm:$0xff] }
 0x413   :  { %716 = vmatpush.msra.mxu2 %v664_v46 }
 0x414   :  { %v485_v13 = vpop.permute.xlu0 %484 }
 0x415   :  { %847 = vmatmul.msk.bf16.vlgmr.msrb.gmra.mxu3 %vm290_vm9, %v463_v47  ;;  %v663_v47 = vld [vmem:[#allocation9 + $0x50] sm:$0xff] }
 0x416   :  { %617 = vmatpush.bf16.msra.mxu3 %v880_v11  ;;  %717 = vmatpush.msra.mxu2 %v663_v47  ;;  %v673_v11 = vld [vmem:[#allocation11 + $0x18] sm:$0xff] }
 0x473   :  { %v306_v49 = vpop.f32.mrf.mxu2 }
 0x474   :  { %v307_v50 = vadd.f32 %v306_v49, %v288_v48  ;;  %v662_v48 = vld [vmem:[#allocation9 + $0x48] sm:$0xff]  ;;  %v661_v49 = vld [vmem:[#allocation9 + $0x40] sm:$0xff] }
 0x475   :  { %718 = vmatpush.msra.mxu2 %v662_v48 }
 0x476   :  { %v310_v51 = vmax.f32 %v307_v50, 0.0  ;;  %v660_v50 = vld [vmem:[#allocation9 + $0x38] sm:$0xff] }
 0x477   :  { %719 = vmatpush.msra.mxu2 %v661_v49  ;;  %v783_v49 = vlaneseq }
 0x478   :  { %v311_v52 = vpack.c.bf16 %v310_v51, %v310_v51  ;;  %v659_v51 = vld [vmem:[#allocation9 + $0x30] sm:$0xff] }
 0x479   :  { %720 = vmatpush.msra.mxu2 %v660_v50  ;;  %v906_v50 = vld [vmem:[%s1331_s14] ss:$0 sm:$0xff] }
 0x47a   :  { %v313_v53 = vrot.slane %v311_v52, 3 }
 0x47b   :  { %v308_v54 = vpop.f32.mrf.mxu2  ;;  %721 = vmatpush.msra.mxu2 %v659_v51  ;;  %v784_v51 = vand.u32 127, %v783_v49 }
 0x47c   :  { %v317_v55 = vsel %vm314_vm10, %v311_v52, %v313_v53  ;;  %v320_v56 = vsel %vm319_vm11, %v311_v52, %v313_v53  ;;  %v658_v52 = vld [vmem:[#allocation9 + $0x28] sm:$0xff]  ;;  %v657_v53 = vld [vmem:[#allocation9 + $0x20] sm:$0xff]  ;;  %v656_v54 = vld [vmem:[#allocation9 + $0x18] sm:$0xff] }
 0x47d   :  { %v322_v59 = vrot.slane %v320_v56, 1  ;;  %v324_v60 = vunpack.i.h.s16 %v317_v55  ;;  %v839_v61 = vpack.i.b16 %v317_v55, %v317_v55  ;;  %722 = vmatpush.msra.mxu2 %v658_v52  ;;  %v655_v55 = vld [vmem:[#allocation9 + $0x10] sm:$0xff]  ;;  %v654_v56 = vld [vmem:[#allocation9 + $0x8] sm:$0xff]  ;;  %vm785_vm4 = vcmp.lt.s32.totalorder %v784_v51, 8 }
 0x47f   :  { %v326_v0 = vunpack.i.h.s16 %v322_v59  ;;  %v328_v1 = vpack.i.b16 %v324_v60, %v324_v60  ;;  %v840_v2 = vpack.i.b16 %v322_v59, %v322_v59  ;;  %v339_v3 = vsel %vm1261_vm14, %v839_v61, %v338_v58  ;;  %723 = vmatpush.msra.mxu2 %v657_v53  ;;  %v685_v58 = vld [vmem:[#allocation11 + $0x78] sm:$0xff]  ;;  %v684_v59 = vld [vmem:[#allocation11 + $0x70] sm:$0xff]  ;;  %v683_v60 = vld [vmem:[#allocation11 + $0x68] sm:$0xff] }
 0x480   :  { %340 = vst [vmem:[#allocation2] sm:$0x1] %v339_v3  ;;  %738 = vmatpush.msrb.mxu1 %v685_v58  ;;  %v682_v61 = vld [vmem:[#allocation11 + $0x60] sm:$0xff]  ;;  %v677_v3 = vld [vmem:[#allocation11 + $0x38] sm:$0xff] }
 0x481   :  { %v330_v5 = vpack.i.b16 %v326_v0, %v326_v0  ;;  %v342_v6 = vsel %vm1261_vm14, %v328_v1, %v341_v62  ;;  %v345_v7 = vsel %vm1261_vm14, %v840_v2, %v344_v63  ;;  %724 = vmatpush.msra.mxu2 %v656_v54  ;;  %v681_v62 = vld [vmem:[#allocation11 + $0x58] sm:$0xff]  ;;  %v680_v0 = vld [vmem:[#allocation11 + $0x50] sm:$0xff]  ;;  %v679_v1 = vld [vmem:[#allocation11 + $0x48] sm:$0xff] }
 0x482   :  { %343 = vst [vmem:[#allocation2 + $0x1] sm:$0x1] %v342_v6  ;;  %739 = vmatpush.msrb.mxu1 %v684_v59  ;;  %v678_v2 = vld [vmem:[#allocation11 + $0x40] sm:$0xff]  ;;  %v676_v6 = vld [vmem:[#allocation11 + $0x30] sm:$0xff] }
 0x483   :  { %346 = vst [vmem:[#allocation2 + $0x2] sm:$0x1] %v345_v7  ;;  %v348_v8 = vsel %vm1261_vm14, %v330_v5, %v347_v4  ;;  %725 = vmatpush.msra.mxu2 %v655_v55 }
 0x484   :  { %349 = vst [vmem:[#allocation2 + $0x3] sm:$0x1] %v348_v8  ;;  %740 = vmatpush.msrb.mxu1 %v683_v60  ;;  %v675_v8 = vld [vmem:[#allocation11 + $0x28] sm:$0xff] }
 0x485   :  { %726 = vmatpush.msra.mxu2 %v654_v56 }
 0x486   :  { %741 = vmatpush.msrb.mxu1 %v682_v61 }
 0x487   :  { %v531_v30 = vld [vmem:[#allocation2] sm:$0x1]  ;;  %727 = vmatpush.msra.mxu2 %v653_v57 }
 0x488   :  { %742 = vmatpush.msrb.mxu1 %v681_v62 }
 0x489   :  { %v534_v35 = vld [vmem:[#allocation2 + $0x1] sm:$0x1] }
 0x48a   :  { %v537_v36 = vld [vmem:[#allocation2 + $0x2] sm:$0x1]  ;;  %743 = vmatpush.msrb.mxu1 %v680_v0 }
 0x48b   :  { %v540_v40 = vld [vmem:[#allocation2 + $0x3] sm:$0x1] }
 0x48c   :  { %744 = vmatpush.msrb.mxu1 %v679_v1 }
 0x48e   :  { %745 = vmatpush.msrb.mxu1 %v678_v2 }
 0x490   :  { %746 = vmatpush.msrb.mxu1 %v677_v3 }
 0x492   :  { %747 = vmatpush.msrb.mxu1 %v676_v6 }
 0x494   :  { %748 = vmatpush.msrb.mxu1 %v675_v8 }
 0x496   :  { %749 = vmatpush.msrb.mxu1 %v674_v10 }
 0x498   :  { %v502_v14 = vpop.f32.mrf.mxu3  ;;  %750 = vmatpush.msrb.mxu1 %v673_v11 }
 0x499   :  { %v503_v15 = vadd.f32 %v502_v14, %v485_v13  ;;  %v903_v13 = vld [vmem:[%s1325_s8] ss:$0 sm:$0xff] }
 0x49a   :  { %751 = vmatpush.msrb.mxu1 %v672_v21 }
 0x49b   :  { %v506_v16 = vmax.f32 %v503_v15, 0.0 }
 0x49d   :  { %v507_v17 = vpack.c.bf16 %v506_v16, %v506_v16 }
 0x49f   :  { %v509_v20 = vrot.slane %v507_v17, 3 }
 0x4a0   :  { %v504_v22 = vpop.f32.mrf.mxu3 }
 0x4a1   :  { %v512_v23 = vsel %vm314_vm10, %v507_v17, %v509_v20  ;;  %v514_v24 = vsel %vm319_vm11, %v507_v17, %v509_v20  ;;  %v671_v22 = vld [vmem:[#allocation11 + $0x8] sm:$0xff] }
 0x4a2   :  { %v516_v27 = vrot.slane %v514_v24, 1  ;;  %v518_v28 = vunpack.i.h.s16 %v512_v23  ;;  %v848_v29 = vpack.i.b16 %v512_v23, %v512_v23  ;;  %v670_v23 = vld [vmem:[#allocation11] sm:$0xff]  ;;  %752 = vmatpush.msrb.mxu1 %v671_v22  ;;  %v702_v24 = vld [vmem:[#allocation12 + $0x78] sm:$0xff] }
 0x4a3   :  { %762 = vmatpush.msrb.mxu3 %v702_v24 }
 0x4a4   :  { %v520_v31 = vunpack.i.h.s16 %v516_v27  ;;  %v522_v32 = vpack.i.b16 %v518_v28, %v518_v28  ;;  %v849_v33 = vpack.i.b16 %v516_v27, %v516_v27  ;;  %v532_v34 = vsel %vm1288_vm0, %v848_v29, %v531_v30  ;;  %753 = vmatpush.msrb.mxu1 %v670_v23  ;;  %v699_v27 = vld [vmem:[#allocation12 + $0x60] sm:$0xff]  ;;  %v698_v28 = vld [vmem:[#allocation12 + $0x58] sm:$0xff]  ;;  %v697_v29 = vld [vmem:[#allocation12 + $0x50] sm:$0xff] }
 0x4a5   :  { %533 = vst [vmem:[#allocation2] sm:$0x1] %v532_v34  ;;  %763 = vmatpush.msrb.mxu3 %v701_v25  ;;  %v696_v30 = vld [vmem:[#allocation12 + $0x48] sm:$0xff] }
 0x4a6   :  { %v524_v37 = vpack.i.b16 %v520_v31, %v520_v31  ;;  %v535_v38 = vsel %vm1288_vm0, %v522_v32, %v534_v35  ;;  %v538_v39 = vsel %vm1288_vm0, %v849_v33, %v537_v36  ;;  %v695_v31 = vld [vmem:[#allocation12 + $0x40] sm:$0xff]  ;;  %v694_v32 = vld [vmem:[#allocation12 + $0x38] sm:$0xff]  ;;  %v693_v33 = vld [vmem:[#allocation12 + $0x30] sm:$0xff] }
 0x4a7   :  { %536 = vst [vmem:[#allocation2 + $0x1] sm:$0x1] %v535_v38  ;;  %764 = vmatpush.msrb.mxu3 %v700_v26  ;;  %v692_v34 = vld [vmem:[#allocation12 + $0x28] sm:$0xff]  ;;  %v691_v35 = vld [vmem:[#allocation12 + $0x20] sm:$0xff]  ;;  %v690_v36 = vld [vmem:[#allocation12 + $0x18] sm:$0xff] }
 0x4a8   :  { %539 = vst [vmem:[#allocation2 + $0x2] sm:$0x1] %v538_v39  ;;  %v541_v41 = vsel %vm1288_vm0, %v524_v37, %v540_v40  ;;  %v904_v37 = vld [vmem:[%s1327_s10] ss:$0 sm:$0xff] }
 0x4a9   :  { %542 = vst [vmem:[#allocation2 + $0x3] sm:$0x1] %v541_v41  ;;  %765 = vmatpush.msrb.mxu3 %v699_v27 }
 0x4ab   :  { %766 = vmatpush.msrb.mxu3 %v698_v28 }
 0x4ac   :  { %v543_v42 = vld [vmem:[#allocation2] sm:$0x1] }
 0x4ad   :  { %861 = vmatmul.msk.bf16.vlgmr.msra.gmra.mxu0 %vm557_vm1, %v543_v42  ;;  %767 = vmatpush.msrb.mxu3 %v697_v29  ;;  %v689_v42 = vld [vmem:[#allocation12 + $0x10] sm:$0xff] }
 0x4ae   :  { %v547_v43 = vld [vmem:[#allocation2 + $0x1] sm:$0x1] }
 0x4af   :  { %856 = vmatmul.msk.bf16.vlgmr.msrb.gmra.mxu2 %vm557_vm1, %v547_v43  ;;  %v597_v44 = vld [vmem:[#allocation2 + $0x2] sm:$0x1]  ;;  %768 = vmatpush.msrb.mxu3 %v696_v30 }
 0x4b0   :  { %868 = vmatmul.msk.bf16.vlgmr.msra.gmra.mxu3 %vm557_vm1, %v597_v44  ;;  %v625_v45 = vld [vmem:[#allocation2 + $0x3] sm:$0x1]  ;;  %v687_v44 = vld [vmem:[#allocation12] sm:$0xff] }
 0x4b1   :  { %769 = vmatpush.msrb.mxu3 %v695_v31  ;;  %v688_v43 = vld [vmem:[#allocation12 + $0x8] sm:$0xff] }
 0x4b3   :  { %770 = vmatpush.msrb.mxu3 %v694_v32 }
 0x4b5   :  { %771 = vmatpush.msrb.mxu3 %v693_v33 }
 0x4b7   :  { %772 = vmatpush.msrb.mxu3 %v692_v34 }
 0x4b9   :  { %773 = vmatpush.msrb.mxu3 %v691_v35 }
 0x4bb   :  { %774 = vmatpush.msrb.mxu3 %v690_v36 }
 0x4bd   :  { %875 = vmatmul.msk.bf16.vlgmr.msrb.gmra.mxu0 %vm557_vm1, %v625_v45  ;;  %775 = vmatpush.msrb.mxu3 %v689_v42  ;;  %v905_v45 = vld [vmem:[%s1329_s12] ss:$0 sm:$0xff]  ;;  %s1106_s12 = smov [#allocation14]  }
 0x4be   :  { %s817_s14 = sshll.u32 %s1106_s12, 4  ;;  %s818_s14 = int_to_ptr.vmem [resolvable:$true] %s817_s14 }
 0x4bf   :  { %776 = vmatpush.msrb.mxu3 %v688_v43 }
 0x4c1   :  { %777 = vmatpush.msrb.mxu3 %v687_v44 }
 0x52a   :  { %v592_v63 = vpop.f32.mrf.mxu0 }
 0x532   :  { %v570_v4 = vpop.f32.mrf.mxu2  ;;  %v594_v5 = vpop.f32.mrf.mxu0 }
 0x533   :  { %v619_v7 = vpop.f32.mrf.mxu3  ;;  %v593_v9 = vadd.f32 %v592_v63, %v570_v4 }
 0x535   :  { %v623_v12 = vadd.f32 %v619_v7, %v593_v9 }
 0x53a   :  { %v572_v14 = vpop.f32.mrf.mxu2  ;;  %v647_v15 = vpop.f32.mrf.mxu0 }
 0x53b   :  { %v621_v16 = vpop.f32.mrf.mxu3  ;;  %v651_v17 = vadd.f32 %v647_v15, %v623_v12 }
 0x53d   :  { %v707_v18 = vadd.f32 %v903_v13, %v651_v17 }
 0x53f   :  { %v708_v19 = vmax.f32 %v707_v18, 0.0 }
 0x541   :  { %728 = vmatmul.f32.vlgmr.msra.gmra.mxu2 %v708_v19 }
 0x542   :  { %v649_v20 = vpop.f32.mrf.mxu0 }
 0x5c4   :  { %v729_v38 = vpop.f32.mrf.mxu2 }
 0x5c5   :  { %v730_v39 = vadd.f32 %v904_v37, %v729_v38 }
 0x5c7   :  { %v733_v40 = vmul.f32 0.01, %v730_v39  ;;  %vm732_vm3 = vcmp.gt.f32.partialorder %v730_v39, 0.0 }
 0x5c9   :  { %v734_v41 = vsel %vm732_vm3, %v730_v39, %v733_v40 }
 0x5ca   :  { %754 = vmatmul.f32.vlgmr.msrb.gmra.mxu1 %v734_v41 }
 0x647   :  { %v755_v46 = vpop.f32.mrf.mxu1 }
 0x648   :  { %v756_v47 = vadd.f32 %v905_v45, %v755_v46 }
 0x64a   :  { %v758_v48 = vmax.f32 %v756_v47, 0.0 }
 0x64c   :  { %778 = vmatmul.f32.vlgmr.msrb.gmra.mxu3 %v758_v48 }
 0x6cf   :  { %v779_v52 = vpop.f32.mrf.mxu3 }
 0x6d0   :  { %v780_v53 = vadd.f32 %v906_v50, %v779_v52 }
 0x6d2   :  { %v782_v54 = vmax.f32 %v780_v53, 0.0 }
 0x6d4   :  { %v786_v55 = vsel %vm785_vm4, %v782_v54, -1e+30 }
 0x6d5   :  { %v787_v56 = vsel %vm168_vm2, %v786_v55, -inf }
 0x6d6   :  { %788 = vmax.xlane.f32.xlu1 %v787_v56 }
 0x749   :  { %v789_v57 = vpop.xlane.xlu1 %788 }
 0x74a   :  { %v790_v58 = vsub.f32 %v786_v55, %v789_v57 }
 0x74c   :  { %v791_v59 = vmul.f32 1.442695, %v790_v58 }
 0x74e   :  { %907 = vpow2.f32 %v791_v59 }
 0x754   :  { %v908_v60 = vpop.eup %907 }
 0x755   :  { %v793_v61 = vsel %vm168_vm2, %v908_v60, 0.0 }
 0x756   :  { %794 = vadd.xlane.f32.xlu2 %v793_v61 }
 0x7c9   :  { %v795_v62 = vpop.xlane.xlu2 %794 }
 0x7ca   :  { %909 = vrcp.f32 %v795_v62  ;;  %v807_v2 = vand.u32 2147483648, %v795_v62  ;;  %v805_v4 = vand.u32 2147483647, %v795_v62  ;;  %vm801_vm6 = vweird.f32 %v795_v62 }
 0x7cc   :  { %v808_v6 = vor.u32 1.1754944e-38, %v807_v2  ;;  %vm806_vm2 = vcmp.eq.f32.partialorder %v805_v4, 8.507059e+37 }
 0x7d0   :  { %v910_v63 = vpop.eup %909 }
 0x7d1   :  { %v797_v0 = vmul.f32 %v910_v63, %v795_v62  ;;  %vm802_vm5 = vweird.f32 %v910_v63 }
 0x7d2   :  { %vm803_vm7 = vmor %vm801_vm6, %vm802_vm5 }
 0x7d3   :  { %v798_v1 = vsub.f32 1.0, %v797_v0 }
 0x7d5   :  { %v799_v3 = vmul.f32 %v910_v63, %v798_v1 }
 0x7d7   :  { %v800_v5 = vadd.f32 %v910_v63, %v799_v3 }
 0x7d9   :  { %v804_v7 = vsel %vm803_vm7, %v910_v63, %v800_v5 }
 0x7da   :  { %v809_v8 = vsel %vm806_vm2, %v808_v6, %v804_v7 }
 0x7db   :  { %v810_v9 = vmul.f32 %v908_v60, %v809_v8 }
 0x7dd   :  { %811 = vst [vmem:[#allocation14] sm:$0x3] %v810_v9 }
 0x7de   :  { %822 = dma.vmem_to_hbm [thread:$0]  %s818_s14, 32, %s820_s9, [#allocation5]  }
 0x7df   :  { %1087 = dma.done.wait [#allocation5], 32  }
 0x7e0   :  { %1088 = vsyncadd [#allocation5], 4294967264 }
 0x7e1   :  { %827 = vsyncpa [#allocation4], 1 }
 0x7e2   :  { %828 = vsyncpa [#allocation7], 1 }
 0x7e3   :  { %829 = vsyncpa [#allocation10], 1 }
 0x7e4   :  { %830 = vsyncpa [#allocation13], 1 }
 0x7e5   :  { %831 = vsyncpa [#allocation5], 1 }

</bundles_post_ra>
